<compile_context>
chip_gen: v6e
topology: v6e:2x2x1
jax: 0.10.0
libtpu: 0.0.40
codegen_flags: <defaults>
</compile_context>

<pallas_src>
import jax
import jax.numpy as jnp
from jax import lax
from jax.experimental import pallas as pl
from jax.experimental.pallas import tpu as pltpu


def _make_pairs(v):
    return v if isinstance(v, tuple) else (v, v)


def _round_up(x, m):
    return ((x + m - 1) // m) * m


def _cdiv(a, b):
    return -(-a // b)


def _make_kernel(kh, kw, sh, sw, H_ceil, W_ceil, tile_oh, OW_p, Cin, N_pad):
    M_t = tile_oh * OW_p

    def kernel(x_ref, w_ref, p_ref, o_ref, acc_ref):
        # x_ref: (1, sh*H_ceil, sw*W_ceil, Cin) bf16  -- phase-decomposed image
        # w_ref: (kh*kw, Cin, N_pad) bf16             -- per-tap weights
        # p_ref: (8, N_pad) f32                       -- bias / BN scale / BN shift
        # o_ref: (1, M_t, N_pad)                      -- output row tile
        # acc_ref: (M_t, N_pad) f32 scratch accumulator
        t = pl.program_id(1)
        for ki in range(kh):
            for kj in range(kw):
                tap = ki * kw + kj
                # phase decomposition -> contiguous (non-strided) slices.
                h0 = (ki % sh) * H_ceil + t * tile_oh + (ki // sh)
                w0 = (kj % sw) * W_ceil + (kj // sw)
                xs = x_ref[0, pl.ds(h0, tile_oh), pl.ds(w0, OW_p), :]
                xs = xs.reshape(M_t, Cin)            # OW_p % 16 == 0 -> layout-preserving
                contrib = jnp.dot(xs, w_ref[tap],
                                  preferred_element_type=jnp.float32)
                if tap == 0:
                    acc_ref[...] = contrib
                else:
                    acc_ref[...] += contrib
        pre = acc_ref[...] + p_ref[0:1, :]           # + conv bias (per channel)
        # tanh-approximate GELU (VPU mul/add + EUP tanh).
        c0 = 0.7978845608028654                      # sqrt(2/pi)
        c1 = 0.044715
        g = 0.5 * pre * (1.0 + jnp.tanh(c0 * (pre + c1 * pre * pre * pre)))
        # Folded inference BatchNorm: y = g * scale + shift.
        y = g * p_ref[1:2, :] + p_ref[2:3, :]
        o_ref[0] = y.astype(o_ref.dtype)

    return kernel


def conv_gelu_bn_forward(x_nchw, weight, bias,
                         bn_gamma, bn_beta, bn_mean, bn_var,
                         *, stride_size, padding=1, eps=1e-5,
                         compute_dtype=jnp.bfloat16, out_dtype=None,
                         nchw_out=True,
                         vmem_budget_bytes=16 * 1024 * 1024,
                         min_grid_steps=8, max_tile_rows=1024):
    """Conv2d(k, s, p) + GELU + BatchNorm2d (inference stats), PyTorch NCHW semantics.

    x_nchw: (B, Cin, H, W);  weight: (Cout, Cin, kh, kw);  bias/bn_*: (Cout,)
    returns (B, Cout, OH, OW)  (or NHWC if nchw_out=False, for fused consumers).
    """
    B, Cin, H, W = x_nchw.shape
    Cout, wcin, kh, kw = weight.shape
    assert wcin == Cin
    sh, sw = _make_pairs(stride_size)
    ph, pw = _make_pairs(padding)
    OH = (H + 2 * ph - kh) // sh + 1
    OW = (W + 2 * pw - kw) // sw + 1
    out_dtype = x_nchw.dtype if out_dtype is None else out_dtype

    N_pad = _round_up(max(Cout, 1), 128)        # lane-dense (unmasked vst) output
    OW_p = _round_up(OW, 16)                    # bf16 sublane granule -> free reshapes
    W_ceil = OW_p + (kw - 1) // sw              # per-phase positions along W

    # ---- choose tile_oh against an explicit VMEM budget (v5e/v6e/v7x safe) ----
    def working_set(tile_oh):
        n_t = _cdiv(OH, tile_oh)
        H_ceil = n_t * tile_oh + (kh - 1) // sh
        img = 2 * (sh * H_ceil) * _round_up(sw * W_ceil, 16) * _round_up(Cin, 128) * 2
        wgt = 2 * kh * kw * _round_up(Cin, 16) * N_pad * 2   # pessimistic: double-buffered
        prm = 2 * 8 * N_pad * 4
        outb = 2 * tile_oh * OW_p * N_pad * 2
        accb = tile_oh * OW_p * N_pad * 4
        return img + wgt + prm + outb + accb

    q = max(1, _cdiv(min_grid_steps, B))        # want B * n_t >= min_grid_steps
    steps_cap = max(1, OH // q)
    rows_cap = max(1, max_tile_rows // OW_p)
    hi = max(1, min(OH, steps_cap, rows_cap))
    tile_oh = 1
    for cand in range(hi, 0, -1):
        if working_set(cand) <= vmem_budget_bytes:
            tile_oh = cand
            break
    n_t = _cdiv(OH, tile_oh)
    OH_pad = n_t * tile_oh
    H_ceil = OH_pad + (kh - 1) // sh
    M_t = tile_oh * OW_p
    vmem_limit = int(min(100 * 1024 * 1024,
                         max(32 * 1024 * 1024, working_set(tile_oh) * 1.25)))

    # ---- layout glue (no replication; fuses into one XLA pass under jit) ----
    # NCHW -> padded NHWC bf16 -> stride-phase decomposition so every in-kernel
    # kernel-tap read is a contiguous slice (no strided sublane loads).
    x_nhwc = jnp.transpose(x_nchw, (0, 2, 3, 1)).astype(compute_dtype)
    x_sp = jnp.pad(x_nhwc, ((0, 0), (ph, ph), (pw, pw), (0, 0)))
    tgt_h, tgt_w = sh * H_ceil, sw * W_ceil
    cur_h, cur_w = H + 2 * ph, W + 2 * pw
    x_sp = jnp.pad(x_sp, ((0, 0), (0, max(0, tgt_h - cur_h)),
                          (0, max(0, tgt_w - cur_w)), (0, 0)))
    x_sp = x_sp[:, :tgt_h, :tgt_w, :]
    x_ph = x_sp.reshape(B, H_ceil, sh, W_ceil, sw, Cin)
    x_ph = jnp.transpose(x_ph, (0, 2, 1, 4, 3, 5))
    x_ph = x_ph.reshape(B, sh * H_ceil, sw * W_ceil, Cin)

    # weight (Cout, Cin, kh, kw) -> (kh*kw, Cin, N_pad), tap-major.
    w_t = jnp.transpose(weight, (2, 3, 1, 0)).reshape(kh * kw, Cin, Cout)
    w_t = jnp.pad(w_t.astype(compute_dtype), ((0, 0), (0, 0), (0, N_pad - Cout)))

    # Per-channel epilogue params in f32: row0 = conv bias, row1 = BN scale,
    # row2 = BN shift (padded channels stay 0 and are sliced off below).
    scale = (bn_gamma * lax.rsqrt(bn_var + eps)).astype(jnp.float32)
    shift = (bn_beta - bn_mean * scale).astype(jnp.float32)
    params = jnp.zeros((8, N_pad), jnp.float32)
    params = params.at[0, :Cout].set(bias.astype(jnp.float32))
    params = params.at[1, :Cout].set(scale)
    params = params.at[2, :Cout].set(shift)

    kernel = _make_kernel(kh, kw, sh, sw, H_ceil, W_ceil, tile_oh, OW_p, Cin, N_pad)
    grid = (B, n_t)
    cost = pl.CostEstimate(
        flops=2 * B * OH_pad * OW_p * (kh * kw * Cin) * N_pad,
        transcendentals=B * OH_pad * OW_p * N_pad,
        bytes_accessed=int(x_ph.size * 2 + w_t.size * 2 + params.size * 4
                           + B * OH_pad * OW_p * N_pad * 2))

    def run(single_buffer_resident):
        extra = {}
        if single_buffer_resident:
            extra = dict(pipeline_mode=pl.Buffered(1))   # resident blocks: 1 buffer
        gs = pltpu.PrefetchScalarGridSpec(
            num_scalar_prefetch=0,
            grid=grid,
            in_specs=[
                # whole phase-decomposed image, resident per batch (constant in t)
                pl.BlockSpec((1, sh * H_ceil, sw * W_ceil, Cin),
                             lambda b, t: (b, 0, 0, 0)),
                pl.BlockSpec((kh * kw, Cin, N_pad), lambda b, t: (0, 0, 0), **extra),
                pl.BlockSpec((8, N_pad), lambda b, t: (0, 0), **extra),
            ],
            out_specs=pl.BlockSpec((1, M_t, N_pad), lambda b, t: (b, t, 0)),
            scratch_shapes=[pltpu.VMEM((M_t, N_pad), jnp.float32)],
        )
        return pl.pallas_call(
            kernel,
            out_shape=jax.ShapeDtypeStruct((B, OH_pad * OW_p, N_pad), compute_dtype),
            grid_spec=gs,
            compiler_params=pltpu.CompilerParams(
                dimension_semantics=("parallel", "parallel"),
                vmem_limit_bytes=vmem_limit),
            cost_estimate=cost,
        )(x_ph, w_t, params)

    try:
        out_flat = run(True)
    except Exception:
        # Fallback if pipeline_mode=pl.Buffered(1) is unsupported by this JAX.
        out_flat = run(False)

    out = out_flat.reshape(B, OH_pad, OW_p, N_pad)[:, :OH, :OW, :Cout]
    if nchw_out:
        out = jnp.transpose(out, (0, 3, 1, 2))      # PyTorch NCHW layout
    return out.astype(out_dtype)


if __name__ == "__main__":
    key = jax.random.PRNGKey(0)
    ks = jax.random.split(key, 7)

    B, Cin, H, W = 2, 4, 16, 16
    Cout, ksz, stride, pad = 8, 3, 2, 1

    x = jax.random.normal(ks[0], (B, Cin, H, W), dtype=jnp.float32)
    fan_in = Cin * ksz * ksz
    bound = 1.0 / (fan_in ** 0.5)
    weight = jax.random.uniform(ks[1], (Cout, Cin, ksz, ksz),
                                minval=-bound, maxval=bound, dtype=jnp.float32)
    bias = jax.random.uniform(ks[2], (Cout,), minval=-bound, maxval=bound,
                              dtype=jnp.float32)
    bn_gamma = jax.random.uniform(ks[3], (Cout,), minval=0.8, maxval=1.2,
                                  dtype=jnp.float32)
    bn_beta = jax.random.uniform(ks[4], (Cout,), minval=-0.2, maxval=0.2,
                                 dtype=jnp.float32)
    bn_mean = 0.1 * jax.random.normal(ks[5], (Cout,), dtype=jnp.float32)
    bn_var = jax.random.uniform(ks[6], (Cout,), minval=0.8, maxval=1.2,
                                dtype=jnp.float32)

    out = conv_gelu_bn_forward(x, weight, bias, bn_gamma, bn_beta, bn_mean, bn_var,
                               stride_size=stride, padding=pad)
    out = jax.block_until_ready(out)

    # Reference: f32 conv + exact (erf) GELU + inference BatchNorm, NCHW.
    eps = 1e-5
    conv = lax.conv_general_dilated(
        x, weight, (stride, stride), [(pad, pad), (pad, pad)],
        dimension_numbers=("NCHW", "OIHW", "NCHW")) + bias[None, :, None, None]
    gelu_ref = 0.5 * conv * (1.0 + lax.erf(conv * 0.7071067811865476))
    scale_ref = bn_gamma / jnp.sqrt(bn_var + eps)
    shift_ref = bn_beta - bn_mean * scale_ref
    ref = gelu_ref * scale_ref[None, :, None, None] + shift_ref[None, :, None, None]

    OH = (H + 2 * pad - ksz) // stride + 1
    assert out.shape == (B, Cout, OH, OH)
    # Tolerance covers bf16 inputs/outputs (f32 accumulation) + tanh-vs-erf GELU.
    assert jnp.allclose(out, ref, atol=5e-2, rtol=5e-2), \
        float(jnp.max(jnp.abs(out - ref)))

    print("KERNEL_OK")
</pallas_src>

<mosaic_0001>
module attributes {stable_mosaic.version = 11 : i64} {
  func.func @kernel(%arg0: i32, %arg1: i32, %arg2: memref<1x18x34x4xbf16, #tpu.memory_space<vmem>>, %arg3: memref<9x4x128xbf16, #tpu.memory_space<vmem>>, %arg4: memref<8x128xf32, #tpu.memory_space<vmem>>, %arg5: memref<1x32x128xbf16, #tpu.memory_space<vmem>>, %arg6: memref<32x128xf32, #tpu.memory_space<vmem>>) attributes {dimension_semantics = [#tpu.dimension_semantics<parallel>, #tpu.dimension_semantics<parallel>], iteration_bounds = array<i64: 2, 4>, scalar_prefetch = 0 : i64, scratch_operands = 1 : i64, tpu.core_type = #tpu.core_type<tc>, window_params = [{transform_indices = @transform_0, window_bounds = array<i64: 1, 18, 34, 4>}, {pipeline_mode = #tpu.pipeline_mode<synchronous>, transform_indices = @transform_1, window_bounds = array<i64: 9, 4, 128>}, {pipeline_mode = #tpu.pipeline_mode<synchronous>, transform_indices = @transform_2, window_bounds = array<i64: 8, 128>}, {transform_indices = @transform_3, window_bounds = array<i64: 1, 32, 128>}]} {
    %c2_i32 = arith.constant 2 : i32
    %0 = arith.muli %arg1, %c2_i32 : i32
    %c0_i32 = arith.constant 0 : i32
    %1 = arith.addi %c0_i32, %0 : i32
    %c0_i32_0 = arith.constant 0 : i32
    %2 = arith.addi %1, %c0_i32_0 : i32
    %c0 = arith.constant 0 : index
    %3 = arith.index_cast %2 : i32 to index
    %c0_1 = arith.constant 0 : index
    %c0_2 = arith.constant 0 : index
    %4 = vector.load %arg2[%c0, %3, %c0_1, %c0_2] : memref<1x18x34x4xbf16, #tpu.memory_space<vmem>>, vector<1x2x16x4xbf16>
    %5 = vector.shape_cast %4 : vector<1x2x16x4xbf16> to vector<2x16x4xbf16>
    %6 = vector.shape_cast %5 : vector<2x16x4xbf16> to vector<32x4xbf16>
    %c0_3 = arith.constant 0 : index
    %c0_4 = arith.constant 0 : index
    %c0_5 = arith.constant 0 : index
    %7 = vector.load %arg3[%c0_3, %c0_4, %c0_5] : memref<9x4x128xbf16, #tpu.memory_space<vmem>>, vector<1x4x128xbf16>
    %8 = vector.shape_cast %7 : vector<1x4x128xbf16> to vector<4x128xbf16>
    %cst = arith.constant dense<0.000000e+00> : vector<32x128xf32>
    %9 = tpu.matmul %6, %8, %cst {dimension_numbers = #tpu.dot_dimension_numbers<[1], [0], [0], [1], [0, 0, 1, 1], [], []>} : vector<32x4xbf16>, vector<4x128xbf16>, vector<32x128xf32> -> vector<32x128xf32>
    %c0_6 = arith.constant 0 : index
    %c0_7 = arith.constant 0 : index
    %10 = vector.load %arg6[%c0_6, %c0_7] : memref<32x128xf32, #tpu.memory_space<vmem>>, vector<32x128xf32>
    tpu.vector_store %arg6[%c0_6, %c0_7], %9 {strides = array<i32>} : memref<32x128xf32, #tpu.memory_space<vmem>>, vector<32x128xf32>,
    %c2_i32_8 = arith.constant 2 : i32
    %11 = arith.muli %arg1, %c2_i32_8 : i32
    %c0_i32_9 = arith.constant 0 : i32
    %12 = arith.addi %c0_i32_9, %11 : i32
    %c0_i32_10 = arith.constant 0 : i32
    %13 = arith.addi %12, %c0_i32_10 : i32
    %c0_11 = arith.constant 0 : index
    %14 = arith.index_cast %13 : i32 to index
    %c17 = arith.constant 17 : index
    %c0_12 = arith.constant 0 : index
    %15 = vector.load %arg2[%c0_11, %14, %c17, %c0_12] : memref<1x18x34x4xbf16, #tpu.memory_space<vmem>>, vector<1x2x16x4xbf16>
    %16 = vector.shape_cast %15 : vector<1x2x16x4xbf16> to vector<2x16x4xbf16>
    %17 = vector.shape_cast %16 : vector<2x16x4xbf16> to vector<32x4xbf16>
    %c1 = arith.constant 1 : index
    %c0_13 = arith.constant 0 : index
    %c0_14 = arith.constant 0 : index
    %18 = vector.load %arg3[%c1, %c0_13, %c0_14] : memref<9x4x128xbf16, #tpu.memory_space<vmem>>, vector<1x4x128xbf16>
    %19 = vector.shape_cast %18 : vector<1x4x128xbf16> to vector<4x128xbf16>
    %cst_15 = arith.constant dense<0.000000e+00> : vector<32x128xf32>
    %20 = tpu.matmul %17, %19, %cst_15 {dimension_numbers = #tpu.dot_dimension_numbers<[1], [0], [0], [1], [0, 0, 1, 1], [], []>} : vector<32x4xbf16>, vector<4x128xbf16>, vector<32x128xf32> -> vector<32x128xf32>
    %c0_16 = arith.constant 0 : index
    %c0_17 = arith.constant 0 : index
    %21 = vector.load %arg6[%c0_16, %c0_17] : memref<32x128xf32, #tpu.memory_space<vmem>>, vector<32x128xf32>
    %22 = arith.addf %21, %20 : vector<32x128xf32>
    %c0_18 = arith.constant 0 : index
    %c0_19 = arith.constant 0 : index
    %23 = vector.load %arg6[%c0_18, %c0_19] : memref<32x128xf32, #tpu.memory_space<vmem>>, vector<32x128xf32>
    tpu.vector_store %arg6[%c0_18, %c0_19], %22 {strides = array<i32>} : memref<32x128xf32, #tpu.memory_space<vmem>>, vector<32x128xf32>,
    %c2_i32_20 = arith.constant 2 : i32
    %24 = arith.muli %arg1, %c2_i32_20 : i32
    %c0_i32_21 = arith.constant 0 : i32
    %25 = arith.addi %c0_i32_21, %24 : i32
    %c0_i32_22 = arith.constant 0 : i32
    %26 = arith.addi %25, %c0_i32_22 : i32
    %c0_23 = arith.constant 0 : index
    %27 = arith.index_cast %26 : i32 to index
    %c1_24 = arith.constant 1 : index
    %c0_25 = arith.constant 0 : index
    %28 = vector.load %arg2[%c0_23, %27, %c1_24, %c0_25] : memref<1x18x34x4xbf16, #tpu.memory_space<vmem>>, vector<1x2x16x4xbf16>
    %29 = vector.shape_cast %28 : vector<1x2x16x4xbf16> to vector<2x16x4xbf16>
    %30 = vector.shape_cast %29 : vector<2x16x4xbf16> to vector<32x4xbf16>
    %c2 = arith.constant 2 : index
    %c0_26 = arith.constant 0 : index
    %c0_27 = arith.constant 0 : index
    %31 = vector.load %arg3[%c2, %c0_26, %c0_27] : memref<9x4x128xbf16, #tpu.memory_space<vmem>>, vector<1x4x128xbf16>
    %32 = vector.shape_cast %31 : vector<1x4x128xbf16> to vector<4x128xbf16>
    %cst_28 = arith.constant dense<0.000000e+00> : vector<32x128xf32>
    %33 = tpu.matmul %30, %32, %cst_28 {dimension_numbers = #tpu.dot_dimension_numbers<[1], [0], [0], [1], [0, 0, 1, 1], [], []>} : vector<32x4xbf16>, vector<4x128xbf16>, vector<32x128xf32> -> vector<32x128xf32>
    %c0_29 = arith.constant 0 : index
    %c0_30 = arith.constant 0 : index
    %34 = vector.load %arg6[%c0_29, %c0_30] : memref<32x128xf32, #tpu.memory_space<vmem>>, vector<32x128xf32>
    %35 = arith.addf %34, %33 : vector<32x128xf32>
    %c0_31 = arith.constant 0 : index
    %c0_32 = arith.constant 0 : index
    %36 = vector.load %arg6[%c0_31, %c0_32] : memref<32x128xf32, #tpu.memory_space<vmem>>, vector<32x128xf32>
    tpu.vector_store %arg6[%c0_31, %c0_32], %35 {strides = array<i32>} : memref<32x128xf32, #tpu.memory_space<vmem>>, vector<32x128xf32>,
    %c2_i32_33 = arith.constant 2 : i32
    %37 = arith.muli %arg1, %c2_i32_33 : i32
    %c9_i32 = arith.constant 9 : i32
    %38 = arith.addi %c9_i32, %37 : i32
    %c0_i32_34 = arith.constant 0 : i32
    %39 = arith.addi %38, %c0_i32_34 : i32
    %c0_35 = arith.constant 0 : index
    %40 = arith.index_cast %39 : i32 to index
    %c0_36 = arith.constant 0 : index
    %c0_37 = arith.constant 0 : index
    %41 = vector.load %arg2[%c0_35, %40, %c0_36, %c0_37] : memref<1x18x34x4xbf16, #tpu.memory_space<vmem>>, vector<1x2x16x4xbf16>
    %42 = vector.shape_cast %41 : vector<1x2x16x4xbf16> to vector<2x16x4xbf16>
    %43 = vector.shape_cast %42 : vector<2x16x4xbf16> to vector<32x4xbf16>
    %c3 = arith.constant 3 : index
    %c0_38 = arith.constant 0 : index
    %c0_39 = arith.constant 0 : index
    %44 = vector.load %arg3[%c3, %c0_38, %c0_39] : memref<9x4x128xbf16, #tpu.memory_space<vmem>>, vector<1x4x128xbf16>
    %45 = vector.shape_cast %44 : vector<1x4x128xbf16> to vector<4x128xbf16>
    %cst_40 = arith.constant dense<0.000000e+00> : vector<32x128xf32>
    %46 = tpu.matmul %43, %45, %cst_40 {dimension_numbers = #tpu.dot_dimension_numbers<[1], [0], [0], [1], [0, 0, 1, 1], [], []>} : vector<32x4xbf16>, vector<4x128xbf16>, vector<32x128xf32> -> vector<32x128xf32>
    %c0_41 = arith.constant 0 : index
    %c0_42 = arith.constant 0 : index
    %47 = vector.load %arg6[%c0_41, %c0_42] : memref<32x128xf32, #tpu.memory_space<vmem>>, vector<32x128xf32>
    %48 = arith.addf %47, %46 : vector<32x128xf32>
    %c0_43 = arith.constant 0 : index
    %c0_44 = arith.constant 0 : index
    %49 = vector.load %arg6[%c0_43, %c0_44] : memref<32x128xf32, #tpu.memory_space<vmem>>, vector<32x128xf32>
    tpu.vector_store %arg6[%c0_43, %c0_44], %48 {strides = array<i32>} : memref<32x128xf32, #tpu.memory_space<vmem>>, vector<32x128xf32>,
    %c2_i32_45 = arith.constant 2 : i32
    %50 = arith.muli %arg1, %c2_i32_45 : i32
    %c9_i32_46 = arith.constant 9 : i32
    %51 = arith.addi %c9_i32_46, %50 : i32
    %c0_i32_47 = arith.constant 0 : i32
    %52 = arith.addi %51, %c0_i32_47 : i32
    %c0_48 = arith.constant 0 : index
    %53 = arith.index_cast %52 : i32 to index
    %c17_49 = arith.constant 17 : index
    %c0_50 = arith.constant 0 : index
    %54 = vector.load %arg2[%c0_48, %53, %c17_49, %c0_50] : memref<1x18x34x4xbf16, #tpu.memory_space<vmem>>, vector<1x2x16x4xbf16>
    %55 = vector.shape_cast %54 : vector<1x2x16x4xbf16> to vector<2x16x4xbf16>
    %56 = vector.shape_cast %55 : vector<2x16x4xbf16> to vector<32x4xbf16>
    %c4 = arith.constant 4 : index
    %c0_51 = arith.constant 0 : index
    %c0_52 = arith.constant 0 : index
    %57 = vector.load %arg3[%c4, %c0_51, %c0_52] : memref<9x4x128xbf16, #tpu.memory_space<vmem>>, vector<1x4x128xbf16>
    %58 = vector.shape_cast %57 : vector<1x4x128xbf16> to vector<4x128xbf16>
    %cst_53 = arith.constant dense<0.000000e+00> : vector<32x128xf32>
    %59 = tpu.matmul %56, %58, %cst_53 {dimension_numbers = #tpu.dot_dimension_numbers<[1], [0], [0], [1], [0, 0, 1, 1], [], []>} : vector<32x4xbf16>, vector<4x128xbf16>, vector<32x128xf32> -> vector<32x128xf32>
    %c0_54 = arith.constant 0 : index
    %c0_55 = arith.constant 0 : index
    %60 = vector.load %arg6[%c0_54, %c0_55] : memref<32x128xf32, #tpu.memory_space<vmem>>, vector<32x128xf32>
    %61 = arith.addf %60, %59 : vector<32x128xf32>
    %c0_56 = arith.constant 0 : index
    %c0_57 = arith.constant 0 : index
    %62 = vector.load %arg6[%c0_56, %c0_57] : memref<32x128xf32, #tpu.memory_space<vmem>>, vector<32x128xf32>
    tpu.vector_store %arg6[%c0_56, %c0_57], %61 {strides = array<i32>} : memref<32x128xf32, #tpu.memory_space<vmem>>, vector<32x128xf32>,
    %c2_i32_58 = arith.constant 2 : i32
    %63 = arith.muli %arg1, %c2_i32_58 : i32
    %c9_i32_59 = arith.constant 9 : i32
    %64 = arith.addi %c9_i32_59, %63 : i32
    %c0_i32_60 = arith.constant 0 : i32
    %65 = arith.addi %64, %c0_i32_60 : i32
    %c0_61 = arith.constant 0 : index
    %66 = arith.index_cast %65 : i32 to index
    %c1_62 = arith.constant 1 : index
    %c0_63 = arith.constant 0 : index
    %67 = vector.load %arg2[%c0_61, %66, %c1_62, %c0_63] : memref<1x18x34x4xbf16, #tpu.memory_space<vmem>>, vector<1x2x16x4xbf16>
    %68 = vector.shape_cast %67 : vector<1x2x16x4xbf16> to vector<2x16x4xbf16>
    %69 = vector.shape_cast %68 : vector<2x16x4xbf16> to vector<32x4xbf16>
    %c5 = arith.constant 5 : index
    %c0_64 = arith.constant 0 : index
    %c0_65 = arith.constant 0 : index
    %70 = vector.load %arg3[%c5, %c0_64, %c0_65] : memref<9x4x128xbf16, #tpu.memory_space<vmem>>, vector<1x4x128xbf16>
    %71 = vector.shape_cast %70 : vector<1x4x128xbf16> to vector<4x128xbf16>
    %cst_66 = arith.constant dense<0.000000e+00> : vector<32x128xf32>
    %72 = tpu.matmul %69, %71, %cst_66 {dimension_numbers = #tpu.dot_dimension_numbers<[1], [0], [0], [1], [0, 0, 1, 1], [], []>} : vector<32x4xbf16>, vector<4x128xbf16>, vector<32x128xf32> -> vector<32x128xf32>
    %c0_67 = arith.constant 0 : index
    %c0_68 = arith.constant 0 : index
    %73 = vector.load %arg6[%c0_67, %c0_68] : memref<32x128xf32, #tpu.memory_space<vmem>>, vector<32x128xf32>
    %74 = arith.addf %73, %72 : vector<32x128xf32>
    %c0_69 = arith.constant 0 : index
    %c0_70 = arith.constant 0 : index
    %75 = vector.load %arg6[%c0_69, %c0_70] : memref<32x128xf32, #tpu.memory_space<vmem>>, vector<32x128xf32>
    tpu.vector_store %arg6[%c0_69, %c0_70], %74 {strides = array<i32>} : memref<32x128xf32, #tpu.memory_space<vmem>>, vector<32x128xf32>,
    %c2_i32_71 = arith.constant 2 : i32
    %76 = arith.muli %arg1, %c2_i32_71 : i32
    %c0_i32_72 = arith.constant 0 : i32
    %77 = arith.addi %c0_i32_72, %76 : i32
    %c1_i32 = arith.constant 1 : i32
    %78 = arith.addi %77, %c1_i32 : i32
    %c0_73 = arith.constant 0 : index
    %79 = arith.index_cast %78 : i32 to index
    %c0_74 = arith.constant 0 : index
    %c0_75 = arith.constant 0 : index
    %80 = vector.load %arg2[%c0_73, %79, %c0_74, %c0_75] : memref<1x18x34x4xbf16, #tpu.memory_space<vmem>>, vector<1x2x16x4xbf16>
    %81 = vector.shape_cast %80 : vector<1x2x16x4xbf16> to vector<2x16x4xbf16>
    %82 = vector.shape_cast %81 : vector<2x16x4xbf16> to vector<32x4xbf16>
    %c6 = arith.constant 6 : index
    %c0_76 = arith.constant 0 : index
    %c0_77 = arith.constant 0 : index
    %83 = vector.load %arg3[%c6, %c0_76, %c0_77] : memref<9x4x128xbf16, #tpu.memory_space<vmem>>, vector<1x4x128xbf16>
    %84 = vector.shape_cast %83 : vector<1x4x128xbf16> to vector<4x128xbf16>
    %cst_78 = arith.constant dense<0.000000e+00> : vector<32x128xf32>
    %85 = tpu.matmul %82, %84, %cst_78 {dimension_numbers = #tpu.dot_dimension_numbers<[1], [0], [0], [1], [0, 0, 1, 1], [], []>} : vector<32x4xbf16>, vector<4x128xbf16>, vector<32x128xf32> -> vector<32x128xf32>
    %c0_79 = arith.constant 0 : index
    %c0_80 = arith.constant 0 : index
    %86 = vector.load %arg6[%c0_79, %c0_80] : memref<32x128xf32, #tpu.memory_space<vmem>>, vector<32x128xf32>
    %87 = arith.addf %86, %85 : vector<32x128xf32>
    %c0_81 = arith.constant 0 : index
    %c0_82 = arith.constant 0 : index
    %88 = vector.load %arg6[%c0_81, %c0_82] : memref<32x128xf32, #tpu.memory_space<vmem>>, vector<32x128xf32>
    tpu.vector_store %arg6[%c0_81, %c0_82], %87 {strides = array<i32>} : memref<32x128xf32, #tpu.memory_space<vmem>>, vector<32x128xf32>,
    %c2_i32_83 = arith.constant 2 : i32
    %89 = arith.muli %arg1, %c2_i32_83 : i32
    %c0_i32_84 = arith.constant 0 : i32
    %90 = arith.addi %c0_i32_84, %89 : i32
    %c1_i32_85 = arith.constant 1 : i32
    %91 = arith.addi %90, %c1_i32_85 : i32
    %c0_86 = arith.constant 0 : index
    %92 = arith.index_cast %91 : i32 to index
    %c17_87 = arith.constant 17 : index
    %c0_88 = arith.constant 0 : index
    %93 = vector.load %arg2[%c0_86, %92, %c17_87, %c0_88] : memref<1x18x34x4xbf16, #tpu.memory_space<vmem>>, vector<1x2x16x4xbf16>
    %94 = vector.shape_cast %93 : vector<1x2x16x4xbf16> to vector<2x16x4xbf16>
    %95 = vector.shape_cast %94 : vector<2x16x4xbf16> to vector<32x4xbf16>
    %c7 = arith.constant 7 : index
    %c0_89 = arith.constant 0 : index
    %c0_90 = arith.constant 0 : index
    %96 = vector.load %arg3[%c7, %c0_89, %c0_90] : memref<9x4x128xbf16, #tpu.memory_space<vmem>>, vector<1x4x128xbf16>
    %97 = vector.shape_cast %96 : vector<1x4x128xbf16> to vector<4x128xbf16>
    %cst_91 = arith.constant dense<0.000000e+00> : vector<32x128xf32>
    %98 = tpu.matmul %95, %97, %cst_91 {dimension_numbers = #tpu.dot_dimension_numbers<[1], [0], [0], [1], [0, 0, 1, 1], [], []>} : vector<32x4xbf16>, vector<4x128xbf16>, vector<32x128xf32> -> vector<32x128xf32>
    %c0_92 = arith.constant 0 : index
    %c0_93 = arith.constant 0 : index
    %99 = vector.load %arg6[%c0_92, %c0_93] : memref<32x128xf32, #tpu.memory_space<vmem>>, vector<32x128xf32>
    %100 = arith.addf %99, %98 : vector<32x128xf32>
    %c0_94 = arith.constant 0 : index
    %c0_95 = arith.constant 0 : index
    %101 = vector.load %arg6[%c0_94, %c0_95] : memref<32x128xf32, #tpu.memory_space<vmem>>, vector<32x128xf32>
    tpu.vector_store %arg6[%c0_94, %c0_95], %100 {strides = array<i32>} : memref<32x128xf32, #tpu.memory_space<vmem>>, vector<32x128xf32>,
    %c2_i32_96 = arith.constant 2 : i32
    %102 = arith.muli %arg1, %c2_i32_96 : i32
    %c0_i32_97 = arith.constant 0 : i32
    %103 = arith.addi %c0_i32_97, %102 : i32
    %c1_i32_98 = arith.constant 1 : i32
    %104 = arith.addi %103, %c1_i32_98 : i32
    %c0_99 = arith.constant 0 : index
    %105 = arith.index_cast %104 : i32 to index
    %c1_100 = arith.constant 1 : index
    %c0_101 = arith.constant 0 : index
    %106 = vector.load %arg2[%c0_99, %105, %c1_100, %c0_101] : memref<1x18x34x4xbf16, #tpu.memory_space<vmem>>, vector<1x2x16x4xbf16>
    %107 = vector.shape_cast %106 : vector<1x2x16x4xbf16> to vector<2x16x4xbf16>
    %108 = vector.shape_cast %107 : vector<2x16x4xbf16> to vector<32x4xbf16>
    %c8 = arith.constant 8 : index
    %c0_102 = arith.constant 0 : index
    %c0_103 = arith.constant 0 : index
    %109 = vector.load %arg3[%c8, %c0_102, %c0_103] : memref<9x4x128xbf16, #tpu.memory_space<vmem>>, vector<1x4x128xbf16>
    %110 = vector.shape_cast %109 : vector<1x4x128xbf16> to vector<4x128xbf16>
    %cst_104 = arith.constant dense<0.000000e+00> : vector<32x128xf32>
    %111 = tpu.matmul %108, %110, %cst_104 {dimension_numbers = #tpu.dot_dimension_numbers<[1], [0], [0], [1], [0, 0, 1, 1], [], []>} : vector<32x4xbf16>, vector<4x128xbf16>, vector<32x128xf32> -> vector<32x128xf32>
    %c0_105 = arith.constant 0 : index
    %c0_106 = arith.constant 0 : index
    %112 = vector.load %arg6[%c0_105, %c0_106] : memref<32x128xf32, #tpu.memory_space<vmem>>, vector<32x128xf32>
    %113 = arith.addf %112, %111 : vector<32x128xf32>
    %c0_107 = arith.constant 0 : index
    %c0_108 = arith.constant 0 : index
    %114 = vector.load %arg6[%c0_107, %c0_108] : memref<32x128xf32, #tpu.memory_space<vmem>>, vector<32x128xf32>
    tpu.vector_store %arg6[%c0_107, %c0_108], %113 {strides = array<i32>} : memref<32x128xf32, #tpu.memory_space<vmem>>, vector<32x128xf32>,
    %c0_109 = arith.constant 0 : index
    %c0_110 = arith.constant 0 : index
    %115 = vector.load %arg6[%c0_109, %c0_110] : memref<32x128xf32, #tpu.memory_space<vmem>>, vector<32x128xf32>
    %c0_111 = arith.constant 0 : index
    %c0_112 = arith.constant 0 : index
    %116 = vector.load %arg4[%c0_111, %c0_112] : memref<8x128xf32, #tpu.memory_space<vmem>>, vector<1x128xf32>
    %117 = vector.broadcast %116 : vector<1x128xf32> to vector<32x128xf32>
    %118 = arith.addf %115, %117 : vector<32x128xf32>
    %cst_113 = arith.constant 5.000000e-01 : f32
    %119 = vector.broadcast %cst_113 : f32 to vector<32x128xf32>
    %120 = arith.mulf %119, %118 : vector<32x128xf32>
    %cst_114 = arith.constant 4.471500e-02 : f32
    %121 = vector.broadcast %cst_114 : f32 to vector<32x128xf32>
    %122 = arith.mulf %121, %118 : vector<32x128xf32>
    %123 = arith.mulf %122, %118 : vector<32x128xf32>
    %124 = arith.mulf %123, %118 : vector<32x128xf32>
    %125 = arith.addf %118, %124 : vector<32x128xf32>
    %cst_115 = arith.constant 0.797884583 : f32
    %126 = vector.broadcast %cst_115 : f32 to vector<32x128xf32>
    %127 = arith.mulf %126, %125 : vector<32x128xf32>
    %128 = math.tanh %127 : vector<32x128xf32>
    %cst_116 = arith.constant 1.000000e+00 : f32
    %129 = vector.broadcast %cst_116 : f32 to vector<32x128xf32>
    %130 = arith.addf %129, %128 : vector<32x128xf32>
    %131 = arith.mulf %120, %130 : vector<32x128xf32>
    %c1_117 = arith.constant 1 : index
    %c0_118 = arith.constant 0 : index
    %132 = vector.load %arg4[%c1_117, %c0_118] : memref<8x128xf32, #tpu.memory_space<vmem>>, vector<1x128xf32>
    %133 = vector.broadcast %132 : vector<1x128xf32> to vector<32x128xf32>
    %134 = arith.mulf %131, %133 : vector<32x128xf32>
    %c2_119 = arith.constant 2 : index
    %c0_120 = arith.constant 0 : index
    %135 = vector.load %arg4[%c2_119, %c0_120] : memref<8x128xf32, #tpu.memory_space<vmem>>, vector<1x128xf32>
    %136 = vector.broadcast %135 : vector<1x128xf32> to vector<32x128xf32>
    %137 = arith.addf %134, %136 : vector<32x128xf32>
    %138 = arith.truncf %137 : vector<32x128xf32> to vector<32x128xbf16>
    %c0_121 = arith.constant 0 : index
    %c0_122 = arith.constant 0 : index
    %c0_123 = arith.constant 0 : index
    %139 = vector.load %arg5[%c0_121, %c0_122, %c0_123] : memref<1x32x128xbf16, #tpu.memory_space<vmem>>, vector<1x32x128xbf16>
    %140 = vector.shape_cast %139 : vector<1x32x128xbf16> to vector<32x128xbf16>
    %141 = vector.shape_cast %138 : vector<32x128xbf16> to vector<1x32x128xbf16>
    tpu.vector_store %arg5[%c0_121, %c0_122, %c0_123], %141 {strides = array<i32>} : memref<1x32x128xbf16, #tpu.memory_space<vmem>>, vector<1x32x128xbf16>,
    return
  }
  func.func @transform_0(%arg0: i32, %arg1: i32) -> (i32, i32, i32, i32) {
    %c0_i32 = arith.constant 0 : i32
    %c0_i32_0 = arith.constant 0 : i32
    %c0_i32_1 = arith.constant 0 : i32
    %c0_i32_2 = arith.constant 0 : i32
    return %arg0, %c0_i32, %c0_i32_0, %c0_i32_1 : i32, i32, i32, i32
  }
  func.func @transform_1(%arg0: i32, %arg1: i32) -> (i32, i32, i32) {
    %c0_i32 = arith.constant 0 : i32
    %c0_i32_0 = arith.constant 0 : i32
    %c0_i32_1 = arith.constant 0 : i32
    %c0_i32_2 = arith.constant 0 : i32
    return %c0_i32, %c0_i32_0, %c0_i32_1 : i32, i32, i32
  }
  func.func @transform_2(%arg0: i32, %arg1: i32) -> (i32, i32) {
    %c0_i32 = arith.constant 0 : i32
    %c0_i32_0 = arith.constant 0 : i32
    %c0_i32_1 = arith.constant 0 : i32
    return %c0_i32, %c0_i32_0 : i32, i32
  }
  func.func @transform_3(%arg0: i32, %arg1: i32) -> (i32, i32, i32) {
    %c0_i32 = arith.constant 0 : i32
    %c0_i32_0 = arith.constant 0 : i32
    return %arg0, %arg1, %c0_i32 : i32, i32, i32
  }
}

module attributes {stable_mosaic.version = 11 : i64} {
  func.func @kernel(%arg0: i32, %arg1: i32, %arg2: memref<1x18x34x4xbf16, #tpu.memory_space<vmem>>, %arg3: memref<9x4x128xbf16, #tpu.memory_space<vmem>>, %arg4: memref<8x128xf32, #tpu.memory_space<vmem>>, %arg5: memref<1x32x128xbf16, #tpu.memory_space<vmem>>, %arg6: memref<32x128xf32, #tpu.memory_space<vmem>>) attributes {dimension_semantics = [#tpu.dimension_semantics<parallel>, #tpu.dimension_semantics<parallel>], iteration_bounds = array<i64: 2, 4>, scalar_prefetch = 0 : i64, scratch_operands = 1 : i64, tpu.core_type = #tpu.core_type<tc>, window_params = [{transform_indices = @transform_0, window_bounds = array<i64: 1, 18, 34, 4>}, {pipeline_mode = #tpu.pipeline_mode<synchronous>, transform_indices = @transform_1, window_bounds = array<i64: 9, 4, 128>}, {pipeline_mode = #tpu.pipeline_mode<synchronous>, transform_indices = @transform_2, window_bounds = array<i64: 8, 128>}, {transform_indices = @transform_3, window_bounds = array<i64: 1, 32, 128>}]} {
    %c2_i32 = arith.constant 2 : i32
    %0 = arith.muli %arg1, %c2_i32 : i32
    %c0_i32 = arith.constant 0 : i32
    %1 = arith.addi %c0_i32, %0 : i32
    %c0_i32_0 = arith.constant 0 : i32
    %2 = arith.addi %1, %c0_i32_0 : i32
    %c0 = arith.constant 0 : index
    %3 = arith.index_cast %2 : i32 to index
    %c0_1 = arith.constant 0 : index
    %c0_2 = arith.constant 0 : index
    %4 = vector.load %arg2[%c0, %3, %c0_1, %c0_2] : memref<1x18x34x4xbf16, #tpu.memory_space<vmem>>, vector<1x2x16x4xbf16>
    %5 = vector.shape_cast %4 : vector<1x2x16x4xbf16> to vector<2x16x4xbf16>
    %6 = vector.shape_cast %5 : vector<2x16x4xbf16> to vector<32x4xbf16>
    %c0_3 = arith.constant 0 : index
    %c0_4 = arith.constant 0 : index
    %c0_5 = arith.constant 0 : index
    %7 = vector.load %arg3[%c0_3, %c0_4, %c0_5] : memref<9x4x128xbf16, #tpu.memory_space<vmem>>, vector<1x4x128xbf16>
    %8 = vector.shape_cast %7 : vector<1x4x128xbf16> to vector<4x128xbf16>
    %cst = arith.constant dense<0.000000e+00> : vector<32x128xf32>
    %9 = tpu.matmul %6, %8, %cst {dimension_numbers = #tpu.dot_dimension_numbers<[1], [0], [0], [1], [0, 0, 1, 1], [], []>} : vector<32x4xbf16>, vector<4x128xbf16>, vector<32x128xf32> -> vector<32x128xf32>
    %c0_6 = arith.constant 0 : index
    %c0_7 = arith.constant 0 : index
    %10 = vector.load %arg6[%c0_6, %c0_7] : memref<32x128xf32, #tpu.memory_space<vmem>>, vector<32x128xf32>
    tpu.vector_store %arg6[%c0_6, %c0_7], %9 {strides = array<i32>} : memref<32x128xf32, #tpu.memory_space<vmem>>, vector<32x128xf32>,
    %c2_i32_8 = arith.constant 2 : i32
    %11 = arith.muli %arg1, %c2_i32_8 : i32
    %c0_i32_9 = arith.constant 0 : i32
    %12 = arith.addi %c0_i32_9, %11 : i32
    %c0_i32_10 = arith.constant 0 : i32
    %13 = arith.addi %12, %c0_i32_10 : i32
    %c0_11 = arith.constant 0 : index
    %14 = arith.index_cast %13 : i32 to index
    %c17 = arith.constant 17 : index
    %c0_12 = arith.constant 0 : index
    %15 = vector.load %arg2[%c0_11, %14, %c17, %c0_12] : memref<1x18x34x4xbf16, #tpu.memory_space<vmem>>, vector<1x2x16x4xbf16>
    %16 = vector.shape_cast %15 : vector<1x2x16x4xbf16> to vector<2x16x4xbf16>
    %17 = vector.shape_cast %16 : vector<2x16x4xbf16> to vector<32x4xbf16>
    %c1 = arith.constant 1 : index
    %c0_13 = arith.constant 0 : index
    %c0_14 = arith.constant 0 : index
    %18 = vector.load %arg3[%c1, %c0_13, %c0_14] : memref<9x4x128xbf16, #tpu.memory_space<vmem>>, vector<1x4x128xbf16>
    %19 = vector.shape_cast %18 : vector<1x4x128xbf16> to vector<4x128xbf16>
    %cst_15 = arith.constant dense<0.000000e+00> : vector<32x128xf32>
    %20 = tpu.matmul %17, %19, %cst_15 {dimension_numbers = #tpu.dot_dimension_numbers<[1], [0], [0], [1], [0, 0, 1, 1], [], []>} : vector<32x4xbf16>, vector<4x128xbf16>, vector<32x128xf32> -> vector<32x128xf32>
    %c0_16 = arith.constant 0 : index
    %c0_17 = arith.constant 0 : index
    %21 = vector.load %arg6[%c0_16, %c0_17] : memref<32x128xf32, #tpu.memory_space<vmem>>, vector<32x128xf32>
    %22 = arith.addf %21, %20 : vector<32x128xf32>
    %c0_18 = arith.constant 0 : index
    %c0_19 = arith.constant 0 : index
    %23 = vector.load %arg6[%c0_18, %c0_19] : memref<32x128xf32, #tpu.memory_space<vmem>>, vector<32x128xf32>
    tpu.vector_store %arg6[%c0_18, %c0_19], %22 {strides = array<i32>} : memref<32x128xf32, #tpu.memory_space<vmem>>, vector<32x128xf32>,
    %c2_i32_20 = arith.constant 2 : i32
    %24 = arith.muli %arg1, %c2_i32_20 : i32
    %c0_i32_21 = arith.constant 0 : i32
    %25 = arith.addi %c0_i32_21, %24 : i32
    %c0_i32_22 = arith.constant 0 : i32
    %26 = arith.addi %25, %c0_i32_22 : i32
    %c0_23 = arith.constant 0 : index
    %27 = arith.index_cast %26 : i32 to index
    %c1_24 = arith.constant 1 : index
    %c0_25 = arith.constant 0 : index
    %28 = vector.load %arg2[%c0_23, %27, %c1_24, %c0_25] : memref<1x18x34x4xbf16, #tpu.memory_space<vmem>>, vector<1x2x16x4xbf16>
    %29 = vector.shape_cast %28 : vector<1x2x16x4xbf16> to vector<2x16x4xbf16>
    %30 = vector.shape_cast %29 : vector<2x16x4xbf16> to vector<32x4xbf16>
    %c2 = arith.constant 2 : index
    %c0_26 = arith.constant 0 : index
    %c0_27 = arith.constant 0 : index
    %31 = vector.load %arg3[%c2, %c0_26, %c0_27] : memref<9x4x128xbf16, #tpu.memory_space<vmem>>, vector<1x4x128xbf16>
    %32 = vector.shape_cast %31 : vector<1x4x128xbf16> to vector<4x128xbf16>
    %cst_28 = arith.constant dense<0.000000e+00> : vector<32x128xf32>
    %33 = tpu.matmul %30, %32, %cst_28 {dimension_numbers = #tpu.dot_dimension_numbers<[1], [0], [0], [1], [0, 0, 1, 1], [], []>} : vector<32x4xbf16>, vector<4x128xbf16>, vector<32x128xf32> -> vector<32x128xf32>
    %c0_29 = arith.constant 0 : index
    %c0_30 = arith.constant 0 : index
    %34 = vector.load %arg6[%c0_29, %c0_30] : memref<32x128xf32, #tpu.memory_space<vmem>>, vector<32x128xf32>
    %35 = arith.addf %34, %33 : vector<32x128xf32>
    %c0_31 = arith.constant 0 : index
    %c0_32 = arith.constant 0 : index
    %36 = vector.load %arg6[%c0_31, %c0_32] : memref<32x128xf32, #tpu.memory_space<vmem>>, vector<32x128xf32>
    tpu.vector_store %arg6[%c0_31, %c0_32], %35 {strides = array<i32>} : memref<32x128xf32, #tpu.memory_space<vmem>>, vector<32x128xf32>,
    %c2_i32_33 = arith.constant 2 : i32
    %37 = arith.muli %arg1, %c2_i32_33 : i32
    %c9_i32 = arith.constant 9 : i32
    %38 = arith.addi %c9_i32, %37 : i32
    %c0_i32_34 = arith.constant 0 : i32
    %39 = arith.addi %38, %c0_i32_34 : i32
    %c0_35 = arith.constant 0 : index
    %40 = arith.index_cast %39 : i32 to index
    %c0_36 = arith.constant 0 : index
    %c0_37 = arith.constant 0 : index
    %41 = vector.load %arg2[%c0_35, %40, %c0_36, %c0_37] : memref<1x18x34x4xbf16, #tpu.memory_space<vmem>>, vector<1x2x16x4xbf16>
    %42 = vector.shape_cast %41 : vector<1x2x16x4xbf16> to vector<2x16x4xbf16>
    %43 = vector.shape_cast %42 : vector<2x16x4xbf16> to vector<32x4xbf16>
    %c3 = arith.constant 3 : index
    %c0_38 = arith.constant 0 : index
    %c0_39 = arith.constant 0 : index
    %44 = vector.load %arg3[%c3, %c0_38, %c0_39] : memref<9x4x128xbf16, #tpu.memory_space<vmem>>, vector<1x4x128xbf16>
    %45 = vector.shape_cast %44 : vector<1x4x128xbf16> to vector<4x128xbf16>
    %cst_40 = arith.constant dense<0.000000e+00> : vector<32x128xf32>
    %46 = tpu.matmul %43, %45, %cst_40 {dimension_numbers = #tpu.dot_dimension_numbers<[1], [0], [0], [1], [0, 0, 1, 1], [], []>} : vector<32x4xbf16>, vector<4x128xbf16>, vector<32x128xf32> -> vector<32x128xf32>
    %c0_41 = arith.constant 0 : index
    %c0_42 = arith.constant 0 : index
    %47 = vector.load %arg6[%c0_41, %c0_42] : memref<32x128xf32, #tpu.memory_space<vmem>>, vector<32x128xf32>
    %48 = arith.addf %47, %46 : vector<32x128xf32>
    %c0_43 = arith.constant 0 : index
    %c0_44 = arith.constant 0 : index
    %49 = vector.load %arg6[%c0_43, %c0_44] : memref<32x128xf32, #tpu.memory_space<vmem>>, vector<32x128xf32>
    tpu.vector_store %arg6[%c0_43, %c0_44], %48 {strides = array<i32>} : memref<32x128xf32, #tpu.memory_space<vmem>>, vector<32x128xf32>,
    %c2_i32_45 = arith.constant 2 : i32
    %50 = arith.muli %arg1, %c2_i32_45 : i32
    %c9_i32_46 = arith.constant 9 : i32
    %51 = arith.addi %c9_i32_46, %50 : i32
    %c0_i32_47 = arith.constant 0 : i32
    %52 = arith.addi %51, %c0_i32_47 : i32
    %c0_48 = arith.constant 0 : index
    %53 = arith.index_cast %52 : i32 to index
    %c17_49 = arith.constant 17 : index
    %c0_50 = arith.constant 0 : index
    %54 = vector.load %arg2[%c0_48, %53, %c17_49, %c0_50] : memref<1x18x34x4xbf16, #tpu.memory_space<vmem>>, vector<1x2x16x4xbf16>
    %55 = vector.shape_cast %54 : vector<1x2x16x4xbf16> to vector<2x16x4xbf16>
    %56 = vector.shape_cast %55 : vector<2x16x4xbf16> to vector<32x4xbf16>
    %c4 = arith.constant 4 : index
    %c0_51 = arith.constant 0 : index
    %c0_52 = arith.constant 0 : index
    %57 = vector.load %arg3[%c4, %c0_51, %c0_52] : memref<9x4x128xbf16, #tpu.memory_space<vmem>>, vector<1x4x128xbf16>
    %58 = vector.shape_cast %57 : vector<1x4x128xbf16> to vector<4x128xbf16>
    %cst_53 = arith.constant dense<0.000000e+00> : vector<32x128xf32>
    %59 = tpu.matmul %56, %58, %cst_53 {dimension_numbers = #tpu.dot_dimension_numbers<[1], [0], [0], [1], [0, 0, 1, 1], [], []>} : vector<32x4xbf16>, vector<4x128xbf16>, vector<32x128xf32> -> vector<32x128xf32>
    %c0_54 = arith.constant 0 : index
    %c0_55 = arith.constant 0 : index
    %60 = vector.load %arg6[%c0_54, %c0_55] : memref<32x128xf32, #tpu.memory_space<vmem>>, vector<32x128xf32>
    %61 = arith.addf %60, %59 : vector<32x128xf32>
    %c0_56 = arith.constant 0 : index
    %c0_57 = arith.constant 0 : index
    %62 = vector.load %arg6[%c0_56, %c0_57] : memref<32x128xf32, #tpu.memory_space<vmem>>, vector<32x128xf32>
    tpu.vector_store %arg6[%c0_56, %c0_57], %61 {strides = array<i32>} : memref<32x128xf32, #tpu.memory_space<vmem>>, vector<32x128xf32>,
    %c2_i32_58 = arith.constant 2 : i32
    %63 = arith.muli %arg1, %c2_i32_58 : i32
    %c9_i32_59 = arith.constant 9 : i32
    %64 = arith.addi %c9_i32_59, %63 : i32
    %c0_i32_60 = arith.constant 0 : i32
    %65 = arith.addi %64, %c0_i32_60 : i32
    %c0_61 = arith.constant 0 : index
    %66 = arith.index_cast %65 : i32 to index
    %c1_62 = arith.constant 1 : index
    %c0_63 = arith.constant 0 : index
    %67 = vector.load %arg2[%c0_61, %66, %c1_62, %c0_63] : memref<1x18x34x4xbf16, #tpu.memory_space<vmem>>, vector<1x2x16x4xbf16>
    %68 = vector.shape_cast %67 : vector<1x2x16x4xbf16> to vector<2x16x4xbf16>
    %69 = vector.shape_cast %68 : vector<2x16x4xbf16> to vector<32x4xbf16>
    %c5 = arith.constant 5 : index
    %c0_64 = arith.constant 0 : index
    %c0_65 = arith.constant 0 : index
    %70 = vector.load %arg3[%c5, %c0_64, %c0_65] : memref<9x4x128xbf16, #tpu.memory_space<vmem>>, vector<1x4x128xbf16>
    %71 = vector.shape_cast %70 : vector<1x4x128xbf16> to vector<4x128xbf16>
    %cst_66 = arith.constant dense<0.000000e+00> : vector<32x128xf32>
    %72 = tpu.matmul %69, %71, %cst_66 {dimension_numbers = #tpu.dot_dimension_numbers<[1], [0], [0], [1], [0, 0, 1, 1], [], []>} : vector<32x4xbf16>, vector<4x128xbf16>, vector<32x128xf32> -> vector<32x128xf32>
    %c0_67 = arith.constant 0 : index
    %c0_68 = arith.constant 0 : index
    %73 = vector.load %arg6[%c0_67, %c0_68] : memref<32x128xf32, #tpu.memory_space<vmem>>, vector<32x128xf32>
    %74 = arith.addf %73, %72 : vector<32x128xf32>
    %c0_69 = arith.constant 0 : index
    %c0_70 = arith.constant 0 : index
    %75 = vector.load %arg6[%c0_69, %c0_70] : memref<32x128xf32, #tpu.memory_space<vmem>>, vector<32x128xf32>
    tpu.vector_store %arg6[%c0_69, %c0_70], %74 {strides = array<i32>} : memref<32x128xf32, #tpu.memory_space<vmem>>, vector<32x128xf32>,
    %c2_i32_71 = arith.constant 2 : i32
    %76 = arith.muli %arg1, %c2_i32_71 : i32
    %c0_i32_72 = arith.constant 0 : i32
    %77 = arith.addi %c0_i32_72, %76 : i32
    %c1_i32 = arith.constant 1 : i32
    %78 = arith.addi %77, %c1_i32 : i32
    %c0_73 = arith.constant 0 : index
    %79 = arith.index_cast %78 : i32 to index
    %c0_74 = arith.constant 0 : index
    %c0_75 = arith.constant 0 : index
    %80 = vector.load %arg2[%c0_73, %79, %c0_74, %c0_75] : memref<1x18x34x4xbf16, #tpu.memory_space<vmem>>, vector<1x2x16x4xbf16>
    %81 = vector.shape_cast %80 : vector<1x2x16x4xbf16> to vector<2x16x4xbf16>
    %82 = vector.shape_cast %81 : vector<2x16x4xbf16> to vector<32x4xbf16>
    %c6 = arith.constant 6 : index
    %c0_76 = arith.constant 0 : index
    %c0_77 = arith.constant 0 : index
    %83 = vector.load %arg3[%c6, %c0_76, %c0_77] : memref<9x4x128xbf16, #tpu.memory_space<vmem>>, vector<1x4x128xbf16>
    %84 = vector.shape_cast %83 : vector<1x4x128xbf16> to vector<4x128xbf16>
    %cst_78 = arith.constant dense<0.000000e+00> : vector<32x128xf32>
    %85 = tpu.matmul %82, %84, %cst_78 {dimension_numbers = #tpu.dot_dimension_numbers<[1], [0], [0], [1], [0, 0, 1, 1], [], []>} : vector<32x4xbf16>, vector<4x128xbf16>, vector<32x128xf32> -> vector<32x128xf32>
    %c0_79 = arith.constant 0 : index
    %c0_80 = arith.constant 0 : index
    %86 = vector.load %arg6[%c0_79, %c0_80] : memref<32x128xf32, #tpu.memory_space<vmem>>, vector<32x128xf32>
    %87 = arith.addf %86, %85 : vector<32x128xf32>
    %c0_81 = arith.constant 0 : index
    %c0_82 = arith.constant 0 : index
    %88 = vector.load %arg6[%c0_81, %c0_82] : memref<32x128xf32, #tpu.memory_space<vmem>>, vector<32x128xf32>
    tpu.vector_store %arg6[%c0_81, %c0_82], %87 {strides = array<i32>} : memref<32x128xf32, #tpu.memory_space<vmem>>, vector<32x128xf32>,
    %c2_i32_83 = arith.constant 2 : i32
    %89 = arith.muli %arg1, %c2_i32_83 : i32
    %c0_i32_84 = arith.constant 0 : i32
    %90 = arith.addi %c0_i32_84, %89 : i32
    %c1_i32_85 = arith.constant 1 : i32
    %91 = arith.addi %90, %c1_i32_85 : i32
    %c0_86 = arith.constant 0 : index
    %92 = arith.index_cast %91 : i32 to index
    %c17_87 = arith.constant 17 : index
    %c0_88 = arith.constant 0 : index
    %93 = vector.load %arg2[%c0_86, %92, %c17_87, %c0_88] : memref<1x18x34x4xbf16, #tpu.memory_space<vmem>>, vector<1x2x16x4xbf16>
    %94 = vector.shape_cast %93 : vector<1x2x16x4xbf16> to vector<2x16x4xbf16>
    %95 = vector.shape_cast %94 : vector<2x16x4xbf16> to vector<32x4xbf16>
    %c7 = arith.constant 7 : index
    %c0_89 = arith.constant 0 : index
    %c0_90 = arith.constant 0 : index
    %96 = vector.load %arg3[%c7, %c0_89, %c0_90] : memref<9x4x128xbf16, #tpu.memory_space<vmem>>, vector<1x4x128xbf16>
    %97 = vector.shape_cast %96 : vector<1x4x128xbf16> to vector<4x128xbf16>
    %cst_91 = arith.constant dense<0.000000e+00> : vector<32x128xf32>
    %98 = tpu.matmul %95, %97, %cst_91 {dimension_numbers = #tpu.dot_dimension_numbers<[1], [0], [0], [1], [0, 0, 1, 1], [], []>} : vector<32x4xbf16>, vector<4x128xbf16>, vector<32x128xf32> -> vector<32x128xf32>
    %c0_92 = arith.constant 0 : index
    %c0_93 = arith.constant 0 : index
    %99 = vector.load %arg6[%c0_92, %c0_93] : memref<32x128xf32, #tpu.memory_space<vmem>>, vector<32x128xf32>
    %100 = arith.addf %99, %98 : vector<32x128xf32>
    %c0_94 = arith.constant 0 : index
    %c0_95 = arith.constant 0 : index
    %101 = vector.load %arg6[%c0_94, %c0_95] : memref<32x128xf32, #tpu.memory_space<vmem>>, vector<32x128xf32>
    tpu.vector_store %arg6[%c0_94, %c0_95], %100 {strides = array<i32>} : memref<32x128xf32, #tpu.memory_space<vmem>>, vector<32x128xf32>,
    %c2_i32_96 = arith.constant 2 : i32
    %102 = arith.muli %arg1, %c2_i32_96 : i32
    %c0_i32_97 = arith.constant 0 : i32
    %103 = arith.addi %c0_i32_97, %102 : i32
    %c1_i32_98 = arith.constant 1 : i32
    %104 = arith.addi %103, %c1_i32_98 : i32
    %c0_99 = arith.constant 0 : index
    %105 = arith.index_cast %104 : i32 to index
    %c1_100 = arith.constant 1 : index
    %c0_101 = arith.constant 0 : index
    %106 = vector.load %arg2[%c0_99, %105, %c1_100, %c0_101] : memref<1x18x34x4xbf16, #tpu.memory_space<vmem>>, vector<1x2x16x4xbf16>
    %107 = vector.shape_cast %106 : vector<1x2x16x4xbf16> to vector<2x16x4xbf16>
    %108 = vector.shape_cast %107 : vector<2x16x4xbf16> to vector<32x4xbf16>
    %c8 = arith.constant 8 : index
    %c0_102 = arith.constant 0 : index
    %c0_103 = arith.constant 0 : index
    %109 = vector.load %arg3[%c8, %c0_102, %c0_103] : memref<9x4x128xbf16, #tpu.memory_space<vmem>>, vector<1x4x128xbf16>
    %110 = vector.shape_cast %109 : vector<1x4x128xbf16> to vector<4x128xbf16>
    %cst_104 = arith.constant dense<0.000000e+00> : vector<32x128xf32>
    %111 = tpu.matmul %108, %110, %cst_104 {dimension_numbers = #tpu.dot_dimension_numbers<[1], [0], [0], [1], [0, 0, 1, 1], [], []>} : vector<32x4xbf16>, vector<4x128xbf16>, vector<32x128xf32> -> vector<32x128xf32>
    %c0_105 = arith.constant 0 : index
    %c0_106 = arith.constant 0 : index
    %112 = vector.load %arg6[%c0_105, %c0_106] : memref<32x128xf32, #tpu.memory_space<vmem>>, vector<32x128xf32>
    %113 = arith.addf %112, %111 : vector<32x128xf32>
    %c0_107 = arith.constant 0 : index
    %c0_108 = arith.constant 0 : index
    %114 = vector.load %arg6[%c0_107, %c0_108] : memref<32x128xf32, #tpu.memory_space<vmem>>, vector<32x128xf32>
    tpu.vector_store %arg6[%c0_107, %c0_108], %113 {strides = array<i32>} : memref<32x128xf32, #tpu.memory_space<vmem>>, vector<32x128xf32>,
    %c0_109 = arith.constant 0 : index
    %c0_110 = arith.constant 0 : index
    %115 = vector.load %arg6[%c0_109, %c0_110] : memref<32x128xf32, #tpu.memory_space<vmem>>, vector<32x128xf32>
    %c0_111 = arith.constant 0 : index
    %c0_112 = arith.constant 0 : index
    %116 = vector.load %arg4[%c0_111, %c0_112] : memref<8x128xf32, #tpu.memory_space<vmem>>, vector<1x128xf32>
    %117 = vector.broadcast %116 : vector<1x128xf32> to vector<32x128xf32>
    %118 = arith.addf %115, %117 : vector<32x128xf32>
    %cst_113 = arith.constant 5.000000e-01 : f32
    %119 = vector.broadcast %cst_113 : f32 to vector<32x128xf32>
    %120 = arith.mulf %119, %118 : vector<32x128xf32>
    %cst_114 = arith.constant 4.471500e-02 : f32
    %121 = vector.broadcast %cst_114 : f32 to vector<32x128xf32>
    %122 = arith.mulf %121, %118 : vector<32x128xf32>
    %123 = arith.mulf %122, %118 : vector<32x128xf32>
    %124 = arith.mulf %123, %118 : vector<32x128xf32>
    %125 = arith.addf %118, %124 : vector<32x128xf32>
    %cst_115 = arith.constant 0.797884583 : f32
    %126 = vector.broadcast %cst_115 : f32 to vector<32x128xf32>
    %127 = arith.mulf %126, %125 : vector<32x128xf32>
    %128 = math.tanh %127 : vector<32x128xf32>
    %cst_116 = arith.constant 1.000000e+00 : f32
    %129 = vector.broadcast %cst_116 : f32 to vector<32x128xf32>
    %130 = arith.addf %129, %128 : vector<32x128xf32>
    %131 = arith.mulf %120, %130 : vector<32x128xf32>
    %c1_117 = arith.constant 1 : index
    %c0_118 = arith.constant 0 : index
    %132 = vector.load %arg4[%c1_117, %c0_118] : memref<8x128xf32, #tpu.memory_space<vmem>>, vector<1x128xf32>
    %133 = vector.broadcast %132 : vector<1x128xf32> to vector<32x128xf32>
    %134 = arith.mulf %131, %133 : vector<32x128xf32>
    %c2_119 = arith.constant 2 : index
    %c0_120 = arith.constant 0 : index
    %135 = vector.load %arg4[%c2_119, %c0_120] : memref<8x128xf32, #tpu.memory_space<vmem>>, vector<1x128xf32>
    %136 = vector.broadcast %135 : vector<1x128xf32> to vector<32x128xf32>
    %137 = arith.addf %134, %136 : vector<32x128xf32>
    %138 = arith.truncf %137 : vector<32x128xf32> to vector<32x128xbf16>
    %c0_121 = arith.constant 0 : index
    %c0_122 = arith.constant 0 : index
    %c0_123 = arith.constant 0 : index
    %139 = vector.load %arg5[%c0_121, %c0_122, %c0_123] : memref<1x32x128xbf16, #tpu.memory_space<vmem>>, vector<1x32x128xbf16>
    %140 = vector.shape_cast %139 : vector<1x32x128xbf16> to vector<32x128xbf16>
    %141 = vector.shape_cast %138 : vector<32x128xbf16> to vector<1x32x128xbf16>
    tpu.vector_store %arg5[%c0_121, %c0_122, %c0_123], %141 {strides = array<i32>} : memref<1x32x128xbf16, #tpu.memory_space<vmem>>, vector<1x32x128xbf16>,
    return
  }
  func.func @transform_0(%arg0: i32, %arg1: i32) -> (i32, i32, i32, i32) {
    %c0_i32 = arith.constant 0 : i32
    %c0_i32_0 = arith.constant 0 : i32
    %c0_i32_1 = arith.constant 0 : i32
    %c0_i32_2 = arith.constant 0 : i32
    return %arg0, %c0_i32, %c0_i32_0, %c0_i32_1 : i32, i32, i32, i32
  }
  func.func @transform_1(%arg0: i32, %arg1: i32) -> (i32, i32, i32) {
    %c0_i32 = arith.constant 0 : i32
    %c0_i32_0 = arith.constant 0 : i32
    %c0_i32_1 = arith.constant 0 : i32
    %c0_i32_2 = arith.constant 0 : i32
    return %c0_i32, %c0_i32_0, %c0_i32_1 : i32, i32, i32
  }
  func.func @transform_2(%arg0: i32, %arg1: i32) -> (i32, i32) {
    %c0_i32 = arith.constant 0 : i32
    %c0_i32_0 = arith.constant 0 : i32
    %c0_i32_1 = arith.constant 0 : i32
    return %c0_i32, %c0_i32_0 : i32, i32
  }
  func.func @transform_3(%arg0: i32, %arg1: i32) -> (i32, i32, i32) {
    %c0_i32 = arith.constant 0 : i32
    %c0_i32_0 = arith.constant 0 : i32
    return %arg0, %arg1, %c0_i32 : i32, i32, i32
  }
}

</mosaic_0001>

<bundles_post_ra>
// kernel: tpu_custom_call.1
= control target key start
LH: loop header
LB: loop body
LE: loop exit
PB: predicated region body
PF: predicated region fallthrough
CT: control target
= control target key end

     0   :  { %8 = vsyncpa [#allocation4], 0  ;;  %s2192_s0 = inlined_call_operand.vmem [shape: bf16[2,18,34,4], index: 0, kind: input, shape index: {}]   ;;  %s2193_s1 = inlined_call_operand.vmem [shape: bf16[9,4,128], index: 1, kind: input, shape index: {}]   ;;  %s2194_s2 = inlined_call_operand.vmem [shape: f32[8,128], index: 2, kind: input, shape index: {}]   ;;  %s2195_s3 = inlined_call_operand.hbm [shape: bf16[2,128,128], index: 3, kind: output, shape index: {}]  }
   0x1   :  { %10 = vsyncpa [#allocation4 + $0x1], 0  ;;  %s1846_s12 = smov 0   ;;  %s1848_s13 = smov 0  }
   0x2   :  { %s1850_s14 = smov 0   ;;  %s1852_s15 = smov 0  }
   0x3   :  { %s1854_s16 = smov 0   ;;  %s1856_s17 = smov 0  }
   0x4   :  { %s1858_s18 = smov 0   ;;  %s1860_s19 = smov 0  }
   0x5 LB: > { %s1432_s20 = sadd.s32 4294967295, %s1821_s19   ;;  %s1433_s21 = sadd.s32 4294967294, %s1821_s19   ;;  %s1821_s19 = sphi %s1860_s19, %s16_s19   ;;  %s1817_s18 = sphi %s1858_s18, %s2206_s18   ;;  %s1813_s17 = sphi %s1856_s17, %s2205_s17   ;;  %s1809_s16 = sphi %s1854_s16, %s2204_s16   ;;  %s1805_s15 = sphi %s1852_s15, %s2203_s15   ;;  %s1801_s14 = sphi %s1850_s14, %s2202_s14   ;;  %s1797_s13 = sphi %s1848_s13, %s2201_s13   ;;  %s1793_s12 = sphi %s1846_s12, %s2200_s12  }
   0x6   : > { %s25_s22 = sadd.s32 1, %s1813_s17  ;;  %s28_s23 = sadd.s32 1, %s1817_s18 }
   0x7   : > { %p26_p0 = scmp.ge.s32.totalorder %s25_s22, 4  ;;  %p115_p1 = scmp.ne.s32.totalorder %s1801_s14, %s1797_s13 }
   0x8   : > { %p116_p2 = scmp.eq.s32.totalorder %s1432_s20, 7  ;;  %p121_p5 = scmp.ne.s32.totalorder %s1797_s13, %s1793_s12 }
   0x9   : > { %s2208_s22 = smov (%p26_p0, %s25_s22), 0  ;;  %s2210_s23 = smov (!%p26_p0, %s28_s23), %s1817_s18 }
   0xa   : > { %s101_s24 = ssub.s32 %s1813_s17, %s2208_s22  ;;  %p1897_p3 = por %p116_p2, %p115_p1 }
   0xb   : > { %p30_p4 = scmp.ge.s32.totalorder %s2210_s23, 2  ;;  %p122_p6 = scmp.eq.s32.totalorder %s1433_s21, 7 }
   0xc   : > { %p1436_p7 = scmp.ge.s32.totalorder %s1821_s19, 1  ;;  %p154_p9 = scmp.lt.s32.totalorder %s1821_s19, 9 }
   0xd   : > { %s2212_s23 = smov (%p30_p4, %s2210_s23), 0  ;;  %p1906_p8 = por %p122_p6, %p121_p5 }
   0xe   : > { %s100_s27 = ssub.s32 %s1817_s18, %s2212_s23  ;;  %s105_s28 = sadd.s32 1, %s1801_s14 }
   0xf   : > { %s102_s29 = sor.u32 %s101_s24, %s100_s27  ;;  %p155_p10 = pnand %p1436_p7, %p154_p9 }
  0x10   : > { %p103_p11 = scmp.eq.s32.totalorder %s102_s29, 0  ;;  %p178_p12 = scmp.lt.s32.totalorder (!%p155_p10), %s1809_s16, 1 }
  0x11   : > { %158 = sbr.rel (%p155_p10) target bundleno = 339 (0x153), region = 32  ;;  %s175_s29 = sand.u32 (!%p155_p10), 1, %s1797_s13  }
  0x12   : > { %s1915_s30 = scalar_select %p103_p11, %s1801_s14, %s105_s28  }
  0x13   : > { %s1535_s11 = smul.u32 (!%p155_p10), 40, %s1805_s15  ;;  %s1437_s6 = sshll.u32 (!%p155_p10), %s175_s29, 4 }
  0x14   : > { %s1530_s7 = sshll.u32 (!%p155_p10), %s1805_s15, 2  ;;  %s1531_s8 = sshll.u32 (!%p155_p10), %s1809_s16, 4 }
  0x15   : > { %s1823_s5 = smov (!%p155_p10), [#allocation3]  }
  0x16   : > { %v193_v0 = vld [vmem:[%s2193_s1] sm:$0x3]  ;;  %vm211_vm0 = vcmask 1041408   ;;  %v1451_v2 = vld [vmem:[%s2193_s1 + $0x4] sm:$0x3]  ;;  %s179_s10 = scalar_select %p178_p12, %s1809_s16, 1 }
  0x17   : > { %1632 = vmatprep.subr.msk.bf16.mxu0 %vm211_vm0, %v193_v0  ;;  %v213_v1 = vsel %vm211_vm0, %v193_v0, 0  ;;  %v1446_v3 = vld [vmem:[%s2193_s1 + $0x2] sm:$0x3]  ;;  %v1462_v5 = vld [vmem:[%s2193_s1 + $0x6] sm:$0x3]  ;;  %vm204_vm1 = vcmask 31744  }
  0x18   : > { %1579 = vmatpush3.bf16.msra.mxu0 %v213_v1  ;;  %1633 = vmatprep.subr.msk.bf16.mxu1 %vm211_vm0, %v1446_v3  ;;  %v340_v4 = vsel %vm211_vm0, %v1446_v3, 0  ;;  %s1641_s24 = smul.u32 360, %s179_s10  ;;  %v1473_v6 = vld [vmem:[%s2193_s1 + $0x8] sm:$0x3]  ;;  %v1944_v7 = vld [vmem:[%s2193_s1 + $0xa] sm:$0x3] }
  0x19   : > { %1634 = vmatprep.subr.msk.bf16.mxu0 %vm211_vm0, %v1451_v2  ;;  %1585 = vmatpush3.bf16.msra.mxu1 %v340_v4  ;;  %v472_v8 = vsel %vm211_vm0, %v1451_v2, 0  ;;  %v1950_v9 = vld [vmem:[%s2193_s1 + $0xc] sm:$0x3]  ;;  %v1955_v10 = vld [vmem:[%s2193_s1 + $0xe] sm:$0x3]  ;;  %v1968_v12 = vsel %vm211_vm0, %v1462_v5, 0 }
  0x1a   : > { %1635 = vmatprep.subr.msk.bf16.mxu1 %vm211_vm0, %v1462_v5  ;;  %s182_s20 = scalar_lea.vmem %s2192_s0, %s1641_s24  ;;  %vm274_vm2 = vsmask.f32 3328  ;;  %vm275_vm3 = vsmask.f32 7440  ;;  %v1963_v11 = vld [vmem:[%s2193_s1 + $0x10] sm:$0x3] }
  0x1b   : > { %s1965_s28 = scalar_lea.vmem %s182_s20, %s1535_s11  ;;  %v1971_v13 = vsel %vm211_vm0, %v1473_v6, 0  ;;  %v1975_v14 = vsel %vm211_vm0, %v1944_v7, 0  ;;  %v1979_v15 = vsel %vm211_vm0, %v1950_v9, 0  ;;  %v1984_v17 = vsel %vm211_vm0, %v1955_v10, 0  ;;  %vm2004_vm4 = vmor %vm274_vm2, %vm275_vm3  ;;  %s1343_s20 = sadd.s32 %s1531_s8, %s1530_s7 }
  0x1c   : > { %v1715_v16 = vld [vmem:[%s1965_s28] sm:$0xff]   ;;  %v1716_v18 = vld [vmem:[%s1965_s28 + $0x14] sm:$0xff]   ;;  %v1989_v19 = vsel %vm211_vm0, %v1963_v11, 0  ;;  %v268_v20 = vld [vmem:[%s1965_s28 + $0x8] sm:$0xf]  ;;  %s1532_s15 = sshll.u32 %s1343_s20, 6 }
  0x1d   : > { %1580 = vmatprep.mubr.msk.bf16.mxu0 %vm204_vm1, %v1715_v16  ;;  %v269_v21 = vld [vmem:[%s1965_s28 + $0xc] sm:$0xf]  ;;  %v270_v22 = vld [vmem:[%s1965_s28 + $0x10] sm:$0x1]  ;;  %v278_v23 = vshrl.u32 %v268_v20, 16  ;;  %v281_v24 = vshll.u32 %v268_v20, 16  ;;  %s2135_s11 = scalar_lea.hbm %s2195_s3, %s1532_s15 }
  0x1e   : > { %1581 = vmatmul.mubr.msk.bf16.vlgmr.msra.gmra.mxu0 %vm204_vm1, %v1716_v18  ;;  %v287_v25 = vshll.u32 %v269_v21, 16  ;;  %v291_v26 = vshrl.u32 %v269_v21, 16  ;;  %v403_v27 = vld [vmem:[%s1965_s28] sm:$0xf]  ;;  %v297_v28 = vshll.u32 %v270_v22, 16  ;;  %s177_s16 = scalar_lea.vmem [#allocation3], %s1437_s6 }
  0x1f   : > { %1591 = vmatpush3.bf16.msra.mxu0 %v472_v8  ;;  %v404_v29 = vld [vmem:[%s1965_s28 + $0x4] sm:$0xf]  ;;  %v405_v30 = vld [vmem:[%s1965_s28 + $0x8] sm:$0x1]  ;;  %v410_v31 = vshrl.u32 %v403_v27, 16  ;;  %v280_v32 = vrot.slane %v278_v23, 4 }
  0x20   : > { %v283_v33 = vrot.slane %v281_v24, 5  ;;  %v289_v34 = vrot.slane %v287_v25, 5  ;;  %v293_v35 = vrot.slane %v291_v26, 4  ;;  %v271_v36 = vld [vmem:[%s1965_s28 + $0x1c] sm:$0xf]  ;;  %1636 = vmatprep.subr.msk.bf16.mxu0 %vm211_vm0, %v1473_v6  ;;  %v299_v37 = vrot.slane %v297_v28, 5 }
  0x21   : > { %v412_v38 = vrot.slane %v410_v31, 4  ;;  %v413_v39 = vshll.u32 %v403_v27, 16  ;;  %v419_v40 = vshll.u32 %v404_v29, 16  ;;  %v423_v43 = vshrl.u32 %v404_v29, 16  ;;  %v272_v45 = vld [vmem:[%s1965_s28 + $0x20] sm:$0xf] }
  0x22   : > { %v284_v41 = vor.u32 %v283_v33, %v280_v32  ;;  %v294_v42 = vor.u32 %v293_v35, %v289_v34  ;;  %v429_v44 = vshll.u32 %v405_v30, 16  ;;  %v273_v49 = vld [vmem:[%s1965_s28 + $0x24] sm:$0x1]  ;;  %v302_v50 = vshrl.u32 %v271_v36, 16  ;;  %v406_v56 = vld [vmem:[%s1965_s28 + $0x14] sm:$0xf] }
  0x23   : > { %v415_v47 = vrot.slane %v413_v39, 5  ;;  %v421_v48 = vrot.slane %v419_v40, 5  ;;  %v305_v51 = vshll.u32 %v271_v36, 16  ;;  %v425_v54 = vrot.slane %v423_v43, 4  ;;  %v407_v1 = vld [vmem:[%s1965_s28 + $0x18] sm:$0xf] }
  0x24   : > { %v285_v52 = vrot.slane %v284_v41, 4  ;;  %v295_v53 = vrot.slane %v294_v42, 4  ;;  %v431_v55 = vrot.slane %v429_v44, 5  ;;  %v304_v58 = vrot.slane %v302_v50, 4  ;;  %v408_v6 = vld [vmem:[%s1965_s28 + $0x1c] sm:$0x1] }
  0x25   : > { %v416_v57 = vor.u32 %v415_v47, %v412_v38  ;;  %v307_v59 = vrot.slane %v305_v51, 5  ;;  %v311_v60 = vshll.u32 %v272_v45, 16  ;;  %v426_v63 = vor.u32 %v425_v54, %v421_v48  ;;  %v1467_v8 = vld [vmem:[%s1965_s28 + $0xbc] sm:$0xf]  ;;  %v1468_v30 = vld [vmem:[%s1965_s28 + $0xc0] sm:$0xf] }
  0x26   : > { %v290_v61 = vsel %vm2004_vm4, %v285_v52, %v289_v34  ;;  %v300_v62 = vsel %vm2004_vm4, %v295_v53, %v299_v37  ;;  %v315_v0 = vshrl.u32 %v272_v45, 16  ;;  %v321_v20 = vshll.u32 %v273_v49, 16  ;;  %v1469_v35 = vld [vmem:[%s1965_s28 + $0xc4] sm:$0x1]  ;;  %v1470_v40 = vld [vmem:[%s1965_s28 + $0xd0] sm:$0xf] }
  0x27   : > { %v1447_v2 = vcombine.low %v290_v61, %v300_v62  ;;  %v417_v3 = vrot.slane %v416_v57, 4  ;;  %v308_v4 = vor.u32 %v307_v59, %v304_v58  ;;  %v313_v5 = vrot.slane %v311_v60, 5  ;;  %v1471_v45 = vld [vmem:[%s1965_s28 + $0xd4] sm:$0xf]  ;;  %v1472_v62 = vld [vmem:[%s1965_s28 + $0xd8] sm:$0x1] }
  0x28   : > { %v427_v16 = vrot.slane %v426_v63, 4  ;;  %v317_v18 = vrot.slane %v315_v0, 4  ;;  %v434_v21 = vshrl.u32 %v406_v56, 16  ;;  %v437_v24 = vshll.u32 %v406_v56, 16  ;;  %v1717_v50 = vld [vmem:[%s1965_s28 + $0xb4] sm:$0xff]   ;;  %s1346_s21 = sshll.u32 %s177_s16, 4  ;;  %s2137_s21 = int_to_ptr.vmem [resolvable:$true] %s1346_s21 }
  0x29   : > { %1586 = vmatprep.mubr.msk.bf16.mxu1 %vm204_vm1, %v1447_v2  ;;  %v422_v22 = vsel %vm2004_vm4, %v417_v3, %v421_v48  ;;  %v309_v23 = vrot.slane %v308_v4, 4  ;;  %v443_v25 = vshll.u32 %v407_v1, 16  ;;  %v323_v28 = vrot.slane %v321_v20, 5  ;;  %s2141_s24 = scalar_lea.sflag [#allocation4], %s175_s29  ;;  %s1729_s4 = scalar_lea.vmem %s2137_s21, 256 }
  0x2a   : > { %v432_v26 = vsel %vm2004_vm4, %v427_v16, %v431_v55  ;;  %v318_v27 = vor.u32 %v317_v18, %v313_v5  ;;  %v436_v29 = vrot.slane %v434_v21, 4  ;;  %v439_v33 = vrot.slane %v437_v24, 5  ;;  %p1730_p13 = scmp.ne.s32.totalorder %s2137_s21, %s1729_s4  ;;  %s1733_s6 = sshll.u32 %s1823_s5, 4  ;;  %s1734_s6 = int_to_ptr.vmem [resolvable:$false] %s1733_s6 }
  0x2b   : > { %v1452_v31 = vcombine.low %v422_v22, %v432_v26  ;;  %v314_v32 = vsel %vm2004_vm4, %v309_v23, %v313_v5  ;;  %v445_v34 = vrot.slane %v443_v25, 5  ;;  %v447_v37 = vshrl.u32 %v407_v1, 16  ;;  %v1478_v1 = vld [vmem:[%s1965_s28 + $0xb4] sm:$0xf]  ;;  %v1479_v22 = vld [vmem:[%s1965_s28 + $0xb8] sm:$0xf]  ;;  %p1736_p2 = scmp.lt.s32.totalorder %s2137_s21, %s1734_s6 }
  0x2c   : > { %v319_v36 = vrot.slane %v318_v27, 4  ;;  %v453_v38 = vshll.u32 %v408_v6, 16  ;;  %v632_v39 = vshrl.u32 %v1467_v8, 16  ;;  %v440_v41 = vor.u32 %v439_v33, %v436_v29  ;;  %v1718_v26 = vld [vmem:[%s1965_s28 + $0xc8] sm:$0xff]   ;;  %v1480_v29 = vld [vmem:[%s1965_s28 + $0xbc] sm:$0x1]  ;;  %p1731_p0 = pnand %p1730_p13, %p1897_p3 }
  0x2d   : > { %1592 = vmatprep.mubr.msk.bf16.mxu0 %vm204_vm1, %v1452_v31  ;;  %v635_v42 = vshll.u32 %v1467_v8, 16  ;;  %v641_v43 = vshll.u32 %v1468_v30, 16  ;;  %v645_v44 = vshrl.u32 %v1468_v30, 16  ;;  %v449_v48 = vrot.slane %v447_v37, 4  ;;  %s1735_s7 = scalar_lea.vmem %s1734_s6, 512 }
  0x2e   : > { %v324_v47 = vsel %vm2004_vm4, %v319_v36, %v323_v28  ;;  %v455_v49 = vrot.slane %v453_v38, 5  ;;  %v634_v51 = vrot.slane %v632_v39, 4  ;;  %v441_v53 = vrot.slane %v440_v41, 4  ;;  %v1482_v41 = vld [vmem:[%s1965_s28 + $0xcc] sm:$0xf]  ;;  %p1732_p1 = pneg %p1731_p0  ;;  %p1737_p4 = scmp.lt.s32.totalorder %s1735_s7, %s1729_s4 }
  0x2f   : > { %v1448_v52 = vcombine.low %v314_v32, %v324_v47  ;;  %v637_v54 = vrot.slane %v635_v42, 5  ;;  %v643_v55 = vrot.slane %v641_v43, 5  ;;  %v450_v56 = vor.u32 %v449_v48, %v445_v34  ;;  %v1483_v47 = vld [vmem:[%s1965_s28 + $0xd0] sm:$0x1] }
  0x30   : > { %v647_v57 = vrot.slane %v645_v44, 4  ;;  %v651_v58 = vshll.u32 %v1469_v35, 16  ;;  %v656_v59 = vshrl.u32 %v1470_v40, 16  ;;  %v446_v60 = vsel %vm2004_vm4, %v441_v53, %v445_v34  ;;  %p1738_p5 = por %p1737_p4, %p1736_p2 }
  0x31   : > { %1587 = vmatmul.mubr.msk.bf16.vlgmr.msra.gmra.mxu1 %vm204_vm1, %v1448_v52  ;;  %v638_v61 = vor.u32 %v637_v54, %v634_v51  ;;  %v659_v63 = vshll.u32 %v1470_v40, 16  ;;  %v665_v0 = vshll.u32 %v1471_v45, 16  ;;  %v451_v2 = vrot.slane %v450_v56, 4  ;;  %v1500_v52 = vld [vmem:[%s1965_s28 + $0x1c] sm:$0xf] }
  0x32   : > { %1597 = vmatpush3.bf16.msra.mxu1 %v1968_v12  ;;  %1598 = vmatprep.mubr.msk.bf16.mxu1 %vm204_vm1, %v1717_v50  ;;  %v648_v3 = vor.u32 %v647_v57, %v643_v55  ;;  %v653_v4 = vrot.slane %v651_v58, 5  ;;  %v658_v5 = vrot.slane %v656_v59, 4  ;;  %v669_v18 = vshrl.u32 %v1471_v45, 16  ;;  %p1739_p6 = pnand %p1738_p5, %p1732_p1 }
  0x33   : > { %v639_v6 = vrot.slane %v638_v61, 4  ;;  %1637 = vmatprep.subr.msk.bf16.mxu1 %vm211_vm0, %v1944_v7  ;;  %v661_v8 = vrot.slane %v659_v63, 5  ;;  %v667_v16 = vrot.slane %v665_v0, 5  ;;  %v456_v20 = vsel %vm2004_vm4, %v451_v2, %v455_v49  ;;  %v1481_v7 = vld [vmem:[%s1965_s28 + $0xc8] sm:$0xf] }
  0x34   : > { %v649_v21 = vrot.slane %v648_v3, 4  ;;  %v675_v12 = vshll.u32 %v1472_v62, 16  ;;  %v764_v23 = vshrl.u32 %v1478_v1, 16  ;;  %v1453_v24 = vcombine.low %v446_v60, %v456_v20  ;;  %v1501_v60 = vld [vmem:[%s1965_s28 + $0x20] sm:$0xf] }
  0x35   : > { %v644_v25 = vsel %vm2004_vm4, %v639_v6, %v643_v55  ;;  %v662_v27 = vor.u32 %v661_v8, %v658_v5  ;;  %v671_v28 = vrot.slane %v669_v18, 4  ;;  %v767_v33 = vshll.u32 %v1478_v1, 16  ;;  %v1502_v0 = vld [vmem:[%s1965_s28 + $0x24] sm:$0x1]  ;;  %v1511_v18 = vld [vmem:[%s1965_s28 + $0x14] sm:$0xf] }
  0x36   : > { %v654_v30 = vsel %vm2004_vm4, %v649_v21, %v653_v4  ;;  %v677_v31 = vrot.slane %v675_v12, 5  ;;  %v766_v32 = vrot.slane %v764_v23, 4  ;;  %1593 = vmatmul.mubr.msk.bf16.vlgmr.msra.gmra.mxu0 %vm204_vm1, %v1453_v24  ;;  %v773_v37 = vshll.u32 %v1479_v22, 16  ;;  %v1512_v23 = vld [vmem:[%s1965_s28 + $0x18] sm:$0xf] }
  0x37   : > { %v1474_v34 = vcombine.low %v644_v25, %v654_v30  ;;  %v663_v35 = vrot.slane %v662_v27, 4  ;;  %v672_v36 = vor.u32 %v671_v28, %v667_v16  ;;  %1603 = vmatpush3.bf16.msra.mxu0 %v1971_v13  ;;  %v769_v38 = vrot.slane %v767_v33, 5 }
  0x38   : > { %v777_v39 = vshrl.u32 %v1479_v22, 16  ;;  %v783_v40 = vshll.u32 %v1480_v29, 16  ;;  %v788_v42 = vshrl.u32 %v1481_v7, 16  ;;  %v775_v45 = vrot.slane %v773_v37, 5  ;;  %1638 = vmatprep.subr.msk.bf16.mxu0 %vm211_vm0, %v1950_v9  ;;  %v1719_v9 = vld [vmem:[%s1965_s28 + $0x14] sm:$0xff]  }
  0x39   : > { %1604 = vmatprep.mubr.msk.bf16.mxu0 %vm204_vm1, %v1474_v34  ;;  %1599 = vmatmul.mubr.msk.bf16.vlgmr.msra.gmra.mxu1 %vm204_vm1, %v1718_v26  ;;  %v668_v43 = vsel %vm2004_vm4, %v663_v35, %v667_v16  ;;  %v673_v44 = vrot.slane %v672_v36, 4  ;;  %v791_v48 = vshll.u32 %v1481_v7, 16  ;;  %v770_v13 = vor.u32 %v769_v38, %v766_v32  ;;  %v1513_v7 = vld [vmem:[%s1965_s28 + $0x1c] sm:$0x1]  ;;  %v1720_v32 = vld [vmem:[%s1965_s28 + $0x28] sm:$0xff]  }
  0x3a   : > { %1609 = vmatpush3.bf16.msra.mxu1 %v1975_v14  ;;  %v779_v49 = vrot.slane %v777_v39, 4  ;;  %v785_v50 = vrot.slane %v783_v40, 5  ;;  %v790_v51 = vrot.slane %v788_v42, 4  ;;  %v797_v55 = vshll.u32 %v1482_v41, 16  ;;  %v1503_v36 = vld [vmem:[%s1965_s28 + $0x30] sm:$0xf] }
  0x3b   : > { %v678_v53 = vsel %vm2004_vm4, %v673_v44, %v677_v31  ;;  %1639 = vmatprep.subr.msk.bf16.mxu1 %vm211_vm0, %v1955_v10  ;;  %v793_v54 = vrot.slane %v791_v48, 5  ;;  %v801_v56 = vshrl.u32 %v1482_v41, 16  ;;  %v771_v57 = vrot.slane %v770_v13, 4  ;;  %v1504_v40 = vld [vmem:[%s1965_s28 + $0x34] sm:$0xf] }
  0x3c   : > { %v1475_v14 = vcombine.low %v668_v43, %v678_v53  ;;  %v780_v58 = vor.u32 %v779_v49, %v775_v45  ;;  %v807_v59 = vshll.u32 %v1483_v47, 16  ;;  %v799_v62 = vrot.slane %v797_v55, 5 }
  0x3d   : > { %v794_v61 = vor.u32 %v793_v54, %v790_v51  ;;  %v803_v63 = vrot.slane %v801_v56, 4  ;;  %v986_v1 = vshrl.u32 %v1500_v52, 16  ;;  %v776_v2 = vsel %vm2004_vm4, %v771_v57, %v775_v45  ;;  %v1514_v54 = vld [vmem:[%s1965_s28 + $0x28] sm:$0xf] }
  0x3e   : > { %v781_v10 = vrot.slane %v780_v58, 4  ;;  %v809_v3 = vrot.slane %v807_v59, 5  ;;  %v989_v4 = vshll.u32 %v1500_v52, 16  ;;  %1605 = vmatmul.mubr.msk.bf16.vlgmr.msra.gmra.mxu0 %vm204_vm1, %v1475_v14  ;;  %v995_v16 = vshll.u32 %v1501_v60, 16  ;;  %v1505_v52 = vld [vmem:[%s1965_s28 + $0x38] sm:$0x1] }
  0x3f   : > { %v795_v5 = vrot.slane %v794_v61, 4  ;;  %v804_v6 = vor.u32 %v803_v63, %v799_v62  ;;  %v988_v8 = vrot.slane %v986_v1, 4  ;;  %1615 = vmatpush3.bf16.msra.mxu0 %v1979_v15  ;;  %1616 = vmatprep.mubr.msk.bf16.mxu0 %vm204_vm1, %v1719_v9  ;;  %v999_v12 = vshrl.u32 %v1501_v60, 16  ;;  %v1515_v58 = vld [vmem:[%s1965_s28 + $0x2c] sm:$0xf] }
  0x40   : > { %v786_v20 = vsel %vm2004_vm4, %v781_v10, %v785_v50  ;;  %v991_v21 = vrot.slane %v989_v4, 5  ;;  %v1005_v22 = vshll.u32 %v1502_v0, 16  ;;  %1640 = vmatprep.subr.msk.bf16.mxu0 %vm211_vm0, %v1963_v11  ;;  %v997_v15 = vrot.slane %v995_v16, 5 }
  0x41   : > { %v1485_v24 = vcombine.low %v776_v2, %v786_v20  ;;  %v800_v25 = vsel %vm2004_vm4, %v795_v5, %v799_v62  ;;  %v805_v26 = vrot.slane %v804_v6, 4  ;;  %v1001_v28 = vrot.slane %v999_v12, 4  ;;  %v1516_v2 = vld [vmem:[%s1965_s28 + $0x30] sm:$0x1] }
  0x42   : > { %v992_v27 = vor.u32 %v991_v21, %v988_v8  ;;  %v1007_v29 = vrot.slane %v1005_v22, 5  ;;  %v1118_v30 = vshrl.u32 %v1511_v18, 16  ;;  %v1121_v33 = vshll.u32 %v1511_v18, 16 }
  0x43   : > { %1610 = vmatprep.mubr.msk.bf16.mxu1 %vm204_vm1, %v1485_v24  ;;  %v810_v31 = vsel %vm2004_vm4, %v805_v26, %v809_v3  ;;  %v1127_v34 = vshll.u32 %v1512_v23, 16  ;;  %v1131_v35 = vshrl.u32 %v1512_v23, 16  ;;  %v1002_v11 = vor.u32 %v1001_v28, %v997_v15 }
  0x44   : > { %v1486_v37 = vcombine.low %v800_v25, %v810_v31  ;;  %v993_v38 = vrot.slane %v992_v27, 4  ;;  %v1120_v39 = vrot.slane %v1118_v30, 4  ;;  %v1123_v41 = vrot.slane %v1121_v33, 5 }
  0x45   : > { %v1129_v42 = vrot.slane %v1127_v34, 5  ;;  %v1133_v43 = vrot.slane %v1131_v35, 4  ;;  %v1137_v44 = vshll.u32 %v1513_v7, 16  ;;  %v1003_v47 = vrot.slane %v1002_v11, 4 }
  0x46   : > { %1611 = vmatmul.mubr.msk.bf16.vlgmr.msra.gmra.mxu1 %vm204_vm1, %v1486_v37  ;;  %v998_v45 = vsel %vm2004_vm4, %v993_v38, %v997_v15  ;;  %v1010_v48 = vshrl.u32 %v1503_v36, 16  ;;  %v1013_v13 = vshll.u32 %v1503_v36, 16  ;;  %1617 = vmatmul.mubr.msk.bf16.vlgmr.msra.gmra.mxu0 %vm204_vm1, %v1720_v32  ;;  %v1124_v49 = vor.u32 %v1123_v41, %v1120_v39 }
  0x47   : > { %1621 = vmatpush3.bf16.msra.mxu1 %v1984_v17  ;;  %v1134_v50 = vor.u32 %v1133_v43, %v1129_v42  ;;  %v1139_v51 = vrot.slane %v1137_v44, 5  ;;  %v1019_v53 = vshll.u32 %v1504_v40, 16  ;;  %1627 = vmatpush3.bf16.msra.mxu0 %v1989_v19  ;;  %v1008_v55 = vsel %vm2004_vm4, %v1003_v47, %v1007_v29 }
  0x48   : > { %v1012_v56 = vrot.slane %v1010_v48, 4  ;;  %v1015_v14 = vrot.slane %v1013_v13, 5  ;;  %v1023_v57 = vshrl.u32 %v1504_v40, 16  ;;  %v1507_v9 = vcombine.low %v998_v45, %v1008_v55 }
  0x49   : > { %v1125_v59 = vrot.slane %v1124_v49, 4  ;;  %v1135_v60 = vrot.slane %v1134_v50, 4  ;;  %v1021_v17 = vrot.slane %v1019_v53, 5  ;;  %v1029_v63 = vshll.u32 %v1505_v52, 16 }
  0x4a   : > { %v1016_v61 = vor.u32 %v1015_v14, %v1012_v56  ;;  %v1025_v62 = vrot.slane %v1023_v57, 4  ;;  %v1142_v0 = vshrl.u32 %v1514_v54, 16  ;;  %1622 = vmatprep.mubr.msk.bf16.mxu1 %vm204_vm1, %v1507_v9  ;;  %v1145_v10 = vshll.u32 %v1514_v54, 16 }
  0x4b   : > { %v1130_v19 = vsel %vm2004_vm4, %v1125_v59, %v1129_v42  ;;  %v1140_v1 = vsel %vm2004_vm4, %v1135_v60, %v1139_v51  ;;  %v1151_v3 = vshll.u32 %v1515_v58, 16  ;;  %v1031_v8 = vrot.slane %v1029_v63, 5 }
  0x4c   : > { %v1518_v4 = vcombine.low %v1130_v19, %v1140_v1  ;;  %v1017_v5 = vrot.slane %v1016_v61, 4  ;;  %v1026_v6 = vor.u32 %v1025_v62, %v1021_v17  ;;  %v1144_v16 = vrot.slane %v1142_v0, 4 }
  0x4d   : > { %v1147_v18 = vrot.slane %v1145_v10, 5  ;;  %v1153_v20 = vrot.slane %v1151_v3, 5  ;;  %v1155_v21 = vshrl.u32 %v1515_v58, 16  ;;  %v1161_v23 = vshll.u32 %v1516_v2, 16 }
  0x4e   : > { %1628 = vmatprep.mubr.msk.bf16.mxu0 %vm204_vm1, %v1518_v4  ;;  %v1022_v12 = vsel %vm2004_vm4, %v1017_v5, %v1021_v17  ;;  %v1027_v22 = vrot.slane %v1026_v6, 4 }
  0x4f   : > { %v1148_v24 = vor.u32 %v1147_v18, %v1144_v16  ;;  %v1157_v25 = vrot.slane %v1155_v21, 4  ;;  %v1163_v29 = vrot.slane %v1161_v23, 5 }
  0x50   : > { %v1032_v26 = vsel %vm2004_vm4, %v1027_v22, %v1031_v8 }
  0x51   : > { %v1508_v15 = vcombine.low %v1022_v12, %v1032_v26  ;;  %v1149_v27 = vrot.slane %v1148_v24, 4  ;;  %v1158_v28 = vor.u32 %v1157_v25, %v1153_v20 }
  0x53   : > { %1623 = vmatmul.mubr.msk.bf16.vlgmr.msra.gmra.mxu1 %vm204_vm1, %v1508_v15  ;;  %v1154_v7 = vsel %vm2004_vm4, %v1149_v27, %v1153_v20  ;;  %v1159_v30 = vrot.slane %v1158_v28, 4  ;;  %v1522_v27 = vld [vmem:[%s2194_s2] ss:$0 sm:$0xff] }
  0x55   : > { %v1164_v31 = vsel %vm2004_vm4, %v1159_v30, %v1163_v29 }
  0x56   : > { %v1519_v32 = vcombine.low %v1154_v7, %v1164_v31 }
  0x58   : > { %1629 = vmatmul.mubr.msk.bf16.vlgmr.msra.gmra.mxu0 %vm204_vm1, %v1519_v32 }
  0xde   : > { %v1582_v33 = vpop.f32.mrf.mxu0 }
  0xe0   : > { %v249_v34 = vpop.f32.mrf.mxu0 }
  0xe2   : > { %v1583_v35 = vpop.f32.mrf.mxu0 }
  0xe4   : > { %v252_v38 = vpop.f32.mrf.mxu0 }
  0xf1   : > { %v1588_v36 = vpop.f32.mrf.mxu1 }
  0xf2   : > { %v397_v49 = vadd.f32 %v1588_v36, %v1582_v33 }
  0xf3   : > { %v376_v37 = vpop.f32.mrf.mxu1 }
  0xf4   : > { %v395_v51 = vadd.f32 %v376_v37, %v249_v34 }
  0xf5   : > { %v1589_v11 = vpop.f32.mrf.mxu1 }
  0xf6   : > { %v1594_v39 = vpop.f32.mrf.mxu0  ;;  %v398_v55 = vadd.f32 %v1589_v11, %v1583_v35 }
  0xf7   : > { %v379_v40 = vpop.f32.mrf.mxu1  ;;  %v529_v54 = vadd.f32 %v1594_v39, %v397_v49 }
  0xf8   : > { %v508_v41 = vpop.f32.mrf.mxu0  ;;  %v396_v9 = vadd.f32 %v379_v40, %v252_v38 }
  0xf9   : > { %v1600_v42 = vpop.f32.mrf.mxu1  ;;  %v527_v57 = vadd.f32 %v508_v41, %v395_v51 }
  0xfa   : > { %v1595_v43 = vpop.f32.mrf.mxu0  ;;  %v619_v58 = vadd.f32 %v1600_v42, %v529_v54 }
  0xfb   : > { %v598_v44 = vpop.f32.mrf.mxu1  ;;  %v530_v59 = vadd.f32 %v1595_v43, %v398_v55 }
  0xfc   : > { %v511_v45 = vpop.f32.mrf.mxu0  ;;  %v617_v60 = vadd.f32 %v598_v44, %v527_v57 }
  0xfd   : > { %v1601_v47 = vpop.f32.mrf.mxu1  ;;  %v528_v0 = vadd.f32 %v511_v45, %v396_v9 }
  0xfe   : > { %v1606_v46 = vpop.f32.mrf.mxu0  ;;  %v620_v63 = vadd.f32 %v1601_v47, %v530_v59 }
  0xff   : > { %v601_v13 = vpop.f32.mrf.mxu1  ;;  %v751_v62 = vadd.f32 %v1606_v46, %v619_v58 }
 0x100   : > { %v730_v48 = vpop.f32.mrf.mxu0  ;;  %v618_v10 = vadd.f32 %v601_v13, %v528_v0 }
 0x101   : > { %v749_v19 = vadd.f32 %v730_v48, %v617_v60 }
 0x102   : > { %v1607_v50 = vpop.f32.mrf.mxu0 }
 0x103   : > { %v752_v4 = vadd.f32 %v1607_v50, %v620_v63 }
 0x104   : > { %v733_v52 = vpop.f32.mrf.mxu0 }
 0x105   : > { %v750_v18 = vadd.f32 %v733_v52, %v618_v10 }
 0x106   : > { %v1612_v53 = vpop.f32.mrf.mxu1  ;;  %v1618_v56 = vpop.f32.mrf.mxu0 }
 0x107   : > { %v883_v1 = vadd.f32 %v1612_v53, %v751_v62 }
 0x108   : > { %v862_v14 = vpop.f32.mrf.mxu1  ;;  %v952_v61 = vpop.f32.mrf.mxu0 }
 0x109   : > { %v881_v5 = vadd.f32 %v862_v14, %v749_v19  ;;  %v973_v6 = vadd.f32 %v1618_v56, %v883_v1  ;;  %v1523_v19 = vld [vmem:[%s2194_s2 + $0x1] ss:$0 sm:$0xff] }
 0x10a   : > { %v1613_v17 = vpop.f32.mrf.mxu1  ;;  %v1619_v3 = vpop.f32.mrf.mxu0 }
 0x10b   : > { %v884_v8 = vadd.f32 %v1613_v17, %v752_v4  ;;  %v971_v21 = vadd.f32 %v952_v61, %v881_v5 }
 0x10c   : > { %v865_v2 = vpop.f32.mrf.mxu1  ;;  %v955_v20 = vpop.f32.mrf.mxu0 }
 0x10d   : > { %v882_v23 = vadd.f32 %v865_v2, %v750_v18  ;;  %v974_v24 = vadd.f32 %v1619_v3, %v884_v8 }
 0x10f   : > { %v972_v30 = vadd.f32 %v955_v20, %v882_v23 }
 0x113   : > { %v1624_v16 = vpop.f32.mrf.mxu1 }
 0x114   : > { %v1105_v12 = vadd.f32 %v1624_v16, %v973_v6  ;;  %v1524_v16 = vld [vmem:[%s2194_s2 + $0x2] ss:$0 sm:$0xff] }
 0x115   : > { %v1084_v22 = vpop.f32.mrf.mxu1 }
 0x116   : > { %v1103_v25 = vadd.f32 %v1084_v22, %v971_v21 }
 0x117   : > { %v1625_v26 = vpop.f32.mrf.mxu1 }
 0x118   : > { %v1630_v15 = vpop.f32.mrf.mxu0  ;;  %v1106_v29 = vadd.f32 %v1625_v26, %v974_v24 }
 0x119   : > { %v1237_v28 = vadd.f32 %v1630_v15, %v1105_v12  ;;  %v1087_v7 = vpop.f32.mrf.mxu1 }
 0x11a   : > { %v1216_v31 = vpop.f32.mrf.mxu0  ;;  %v1104_v35 = vadd.f32 %v1087_v7, %v972_v30 }
 0x11b   : > { %v1254_v32 = vadd.f32 %v1522_v27, %v1237_v28  ;;  %v1235_v33 = vadd.f32 %v1216_v31, %v1103_v25 }
 0x11c   : > { %v1631_v34 = vpop.f32.mrf.mxu0 }
 0x11d   : > { %v1262_v36 = vmul.f32 0.044715, %v1254_v32  ;;  %v1252_v37 = vadd.f32 %v1522_v27, %v1235_v33  ;;  %v1238_v38 = vadd.f32 %v1631_v34, %v1106_v29  ;;  %v1258_v59 = vmul.f32 0.5, %v1254_v32 }
 0x11e   : > { %v1219_v41 = vpop.f32.mrf.mxu0 }
 0x11f   : > { %v1266_v11 = vmul.f32 %v1262_v36, %v1254_v32  ;;  %v1260_v39 = vmul.f32 0.044715, %v1252_v37  ;;  %v1255_v40 = vadd.f32 %v1522_v27, %v1238_v38  ;;  %v1236_v42 = vadd.f32 %v1219_v41, %v1104_v35 }
 0x120   : > { %v1256_v0 = vmul.f32 0.5, %v1252_v37 }
 0x121   : > { %v1270_v43 = vmul.f32 %v1266_v11, %v1254_v32  ;;  %v1264_v44 = vmul.f32 %v1260_v39, %v1252_v37  ;;  %v1263_v45 = vmul.f32 0.044715, %v1255_v40  ;;  %v1253_v47 = vadd.f32 %v1522_v27, %v1236_v42 }
 0x122   : > { %v1259_v1 = vmul.f32 0.5, %v1255_v40 }
 0x123   : > { %v1274_v46 = vadd.f32 %v1270_v43, %v1254_v32  ;;  %v1268_v48 = vmul.f32 %v1264_v44, %v1252_v37  ;;  %v1267_v13 = vmul.f32 %v1263_v45, %v1255_v40  ;;  %v1261_v49 = vmul.f32 0.044715, %v1253_v47 }
 0x124   : > { %v1257_v6 = vmul.f32 0.5, %v1253_v47 }
 0x125   : > { %v1278_v50 = vmul.f32 0.7978846, %v1274_v46  ;;  %v1272_v51 = vadd.f32 %v1268_v48, %v1252_v37  ;;  %v1271_v52 = vmul.f32 %v1267_v13, %v1255_v40  ;;  %v1265_v53 = vmul.f32 %v1261_v49, %v1253_v47 }
 0x127   : > { %1721 = vtanh.f32 %v1278_v50  ;;  %v1276_v54 = vmul.f32 0.7978846, %v1272_v51  ;;  %v1275_v55 = vadd.f32 %v1271_v52, %v1255_v40  ;;  %v1269_v56 = vmul.f32 %v1265_v53, %v1253_v47 }
 0x129   : > { %1723 = vtanh.f32 %v1276_v54  ;;  %v1279_v14 = vmul.f32 0.7978846, %v1275_v55  ;;  %v1273_v57 = vadd.f32 %v1269_v56, %v1253_v47 }
 0x12b   : > { %1725 = vtanh.f32 %v1279_v14  ;;  %v1277_v58 = vmul.f32 0.7978846, %v1273_v57 }
 0x12d   : > { %1727 = vtanh.f32 %v1277_v58 }
 0x134   : > { %v1722_v9 = vpop.eup %1721 }
 0x135   : > { %v1286_v60 = vadd.f32 1.0, %v1722_v9 }
 0x136   : > { %v1724_v17 = vpop.eup %1723 }
 0x137   : > { %v1290_v61 = vmul.f32 %v1286_v60, %v1258_v59  ;;  %v1284_v62 = vadd.f32 1.0, %v1724_v17 }
 0x138   : > { %v1726_v63 = vpop.eup %1725 }
 0x139   : > { %v1287_v2 = vadd.f32 1.0, %v1726_v63  ;;  %v1288_v10 = vmul.f32 %v1284_v62, %v1256_v0  ;;  %v1299_v5 = vmul.f32 %v1523_v19, %v1290_v61 }
 0x13a   : > { %v1728_v3 = vpop.eup %1727 }
 0x13b   : > { %v1291_v4 = vmul.f32 %v1287_v2, %v1259_v1  ;;  %v1285_v8 = vadd.f32 1.0, %v1728_v3  ;;  %v1297_v21 = vmul.f32 %v1523_v19, %v1288_v10  ;;  %v1308_v12 = vadd.f32 %v1524_v16, %v1299_v5 }
 0x13d   : > { %v1300_v18 = vmul.f32 %v1523_v19, %v1291_v4  ;;  %v1289_v20 = vmul.f32 %v1285_v8, %v1257_v6  ;;  %v1306_v25 = vadd.f32 %v1524_v16, %v1297_v21 }
 0x13f   : > { %v1309_v22 = vadd.f32 %v1524_v16, %v1300_v18  ;;  %v1298_v23 = vmul.f32 %v1523_v19, %v1289_v20 }
 0x141   : > { %v1548_v24 = vpack.c.bf16 %v1309_v22, %v1308_v12  ;;  %v1307_v26 = vadd.f32 %v1524_v16, %v1298_v23 }
 0x143   : > { %1550 = vst [vmem:[%s177_s16 + $0x8] sm:$0xff] %v1548_v24   ;;  %v1543_v15 = vpack.c.bf16 %v1307_v26, %v1306_v25 }
 0x145   : > { %1544 = vst [vmem:[%s177_s16] sm:$0xff] %v1543_v15  }
 0x146   : > { %1742 = shalt.err (!%p1739_p6)
}
 0x147   : > { %s1743_s29 = scalar_lea.hbm %s2135_s11, 256  ;;  %s1747_s10 = scalar_lea.hbm %s2195_s3, 2048 }
 0x148   : > { %p1744_p7 = scmp.ne.s32.totalorder %s2135_s11, %s1743_s29  ;;  %p1748_p11 = scmp.lt.s32.totalorder %s2135_s11, %s2195_s3 }
 0x149   : > { %p1749_p12 = scmp.lt.s32.totalorder %s1747_s10, %s1743_s29 }
 0x14a   : > { %p1745_p9 = pnand %p1744_p7, %p1897_p3 }
 0x14b   : > { %p1750_p13 = por %p1749_p12, %p1748_p11 }
 0x14c   : > { %p1746_p10 = pneg %p1745_p9 }
 0x14e   : > { %p1751_p0 = pnand %p1750_p13, %p1746_p10 }
 0x150   : > { %1754 = shalt.err (!%p1751_p0)
}
 0x151   : > { %s1824_s16 = smov 64   ;;  %s1825_s27 = smov 4  }
 0x152   : > { %1642 = dma.vmem_to_hbm [thread:$0]  (%p1897_p3), %s2137_s21, 256, %s2135_s11, %s2141_s24, %s1824_s16, %s1824_s16, %s1825_s27  }
 0x153 PF: > { %p1648_p1 = scmp.ge.s32.totalorder %s1821_s19, 2  ;;  %s1361_s28 = sand.u32 1, %s1793_s12  }
 0x154   : > { %s1362_s4 = scalar_lea.sflag [#allocation4], %s1361_s28 }
 0x155   : > { %p1645_p2 = pnand %p1648_p1, %p1906_p8 }
 0x157   : > { %p1646_p4 = pneg %p1645_p2 }
 0x159   : > { %1788 = dma.done.wait (%p1646_p4), %s1362_s4, 256  }
 0x15a   : > { %1790 = vsyncadd (%p1646_p4), %s1362_s4, 4294967040  ;;  %s16_s19 = sadd.s32 1, %s1821_s19   ;;  %s2200_s12 = smov %s1797_s13 }
 0x15b   : > { %p13_p5 = scmp.ge.s32.totalorder %s16_s19, 10   ;;  %s2201_s13 = smov %s1801_s14 }
 0x15c   : > { %s2202_s14 = smov %s1915_s30  ;;  %s2203_s15 = smov %s1813_s17 }
 0x15d   : > { %s2204_s16 = smov %s1817_s18  ;;  %s2205_s17 = smov %s2208_s22 }
 0x15e   : > { %s2206_s18 = smov %s2212_s23  ;;  %15 = sbr.rel (!%p13_p5) target bundleno = 5 (0x5), region = 78 }
 0x163   :  { %1367 = vsyncpa [#allocation4], 1 }
 0x164   :  { %1369 = vsyncpa [#allocation4 + $0x1], 1 }

// kernel: tpu_custom_call.1
= control target key start
LH: loop header
LB: loop body
LE: loop exit
PB: predicated region body
PF: predicated region fallthrough
CT: control target
= control target key end

     0   :  { %8 = vsyncpa [#allocation4], 0  ;;  %s2192_s0 = inlined_call_operand.vmem [shape: bf16[2,18,34,4], index: 0, kind: input, shape index: {}]   ;;  %s2193_s1 = inlined_call_operand.vmem [shape: bf16[9,4,128], index: 1, kind: input, shape index: {}]   ;;  %s2194_s2 = inlined_call_operand.vmem [shape: f32[8,128], index: 2, kind: input, shape index: {}]   ;;  %s2195_s3 = inlined_call_operand.hbm [shape: bf16[2,128,128], index: 3, kind: output, shape index: {}]  }
   0x1   :  { %10 = vsyncpa [#allocation4 + $0x1], 0  ;;  %s1846_s12 = smov 0   ;;  %s1848_s13 = smov 0  }
   0x2   :  { %s1850_s14 = smov 0   ;;  %s1852_s15 = smov 0  }
   0x3   :  { %s1854_s16 = smov 0   ;;  %s1856_s17 = smov 0  }
   0x4   :  { %s1858_s18 = smov 0   ;;  %s1860_s19 = smov 0  }
   0x5 LB: > { %s1432_s20 = sadd.s32 4294967295, %s1821_s19   ;;  %s1433_s21 = sadd.s32 4294967294, %s1821_s19   ;;  %s1821_s19 = sphi %s1860_s19, %s16_s19   ;;  %s1817_s18 = sphi %s1858_s18, %s2206_s18   ;;  %s1813_s17 = sphi %s1856_s17, %s2205_s17   ;;  %s1809_s16 = sphi %s1854_s16, %s2204_s16   ;;  %s1805_s15 = sphi %s1852_s15, %s2203_s15   ;;  %s1801_s14 = sphi %s1850_s14, %s2202_s14   ;;  %s1797_s13 = sphi %s1848_s13, %s2201_s13   ;;  %s1793_s12 = sphi %s1846_s12, %s2200_s12  }
   0x6   : > { %s25_s22 = sadd.s32 1, %s1813_s17  ;;  %s28_s23 = sadd.s32 1, %s1817_s18 }
   0x7   : > { %p26_p0 = scmp.ge.s32.totalorder %s25_s22, 4  ;;  %p115_p1 = scmp.ne.s32.totalorder %s1801_s14, %s1797_s13 }
   0x8   : > { %p116_p2 = scmp.eq.s32.totalorder %s1432_s20, 7  ;;  %p121_p5 = scmp.ne.s32.totalorder %s1797_s13, %s1793_s12 }
   0x9   : > { %s2208_s22 = smov (%p26_p0, %s25_s22), 0  ;;  %s2210_s23 = smov (!%p26_p0, %s28_s23), %s1817_s18 }
   0xa   : > { %s101_s24 = ssub.s32 %s1813_s17, %s2208_s22  ;;  %p1897_p3 = por %p116_p2, %p115_p1 }
   0xb   : > { %p30_p4 = scmp.ge.s32.totalorder %s2210_s23, 2  ;;  %p122_p6 = scmp.eq.s32.totalorder %s1433_s21, 7 }
   0xc   : > { %p1436_p7 = scmp.ge.s32.totalorder %s1821_s19, 1  ;;  %p154_p9 = scmp.lt.s32.totalorder %s1821_s19, 9 }
   0xd   : > { %s2212_s23 = smov (%p30_p4, %s2210_s23), 0  ;;  %p1906_p8 = por %p122_p6, %p121_p5 }
   0xe   : > { %s100_s27 = ssub.s32 %s1817_s18, %s2212_s23  ;;  %s105_s28 = sadd.s32 1, %s1801_s14 }
   0xf   : > { %s102_s29 = sor.u32 %s101_s24, %s100_s27  ;;  %p155_p10 = pnand %p1436_p7, %p154_p9 }
  0x10   : > { %p103_p11 = scmp.eq.s32.totalorder %s102_s29, 0  ;;  %p178_p12 = scmp.lt.s32.totalorder (!%p155_p10), %s1809_s16, 1 }
  0x11   : > { %158 = sbr.rel (%p155_p10) target bundleno = 339 (0x153), region = 32  ;;  %s175_s29 = sand.u32 (!%p155_p10), 1, %s1797_s13  }
  0x12   : > { %s1915_s30 = scalar_select %p103_p11, %s1801_s14, %s105_s28  }
  0x13   : > { %s1535_s11 = smul.u32 (!%p155_p10), 40, %s1805_s15  ;;  %s1437_s6 = sshll.u32 (!%p155_p10), %s175_s29, 4 }
  0x14   : > { %s1530_s7 = sshll.u32 (!%p155_p10), %s1805_s15, 2  ;;  %s1531_s8 = sshll.u32 (!%p155_p10), %s1809_s16, 4 }
  0x15   : > { %s1823_s5 = smov (!%p155_p10), [#allocation3]  }
  0x16   : > { %v193_v0 = vld [vmem:[%s2193_s1] sm:$0x3]  ;;  %vm211_vm0 = vcmask 1041408   ;;  %v1451_v2 = vld [vmem:[%s2193_s1 + $0x4] sm:$0x3]  ;;  %s179_s10 = scalar_select %p178_p12, %s1809_s16, 1 }
  0x17   : > { %1632 = vmatprep.subr.msk.bf16.mxu0 %vm211_vm0, %v193_v0  ;;  %v213_v1 = vsel %vm211_vm0, %v193_v0, 0  ;;  %v1446_v3 = vld [vmem:[%s2193_s1 + $0x2] sm:$0x3]  ;;  %v1462_v5 = vld [vmem:[%s2193_s1 + $0x6] sm:$0x3]  ;;  %vm204_vm1 = vcmask 31744  }
  0x18   : > { %1579 = vmatpush3.bf16.msra.mxu0 %v213_v1  ;;  %1633 = vmatprep.subr.msk.bf16.mxu1 %vm211_vm0, %v1446_v3  ;;  %v340_v4 = vsel %vm211_vm0, %v1446_v3, 0  ;;  %s1641_s24 = smul.u32 360, %s179_s10  ;;  %v1473_v6 = vld [vmem:[%s2193_s1 + $0x8] sm:$0x3]  ;;  %v1944_v7 = vld [vmem:[%s2193_s1 + $0xa] sm:$0x3] }
  0x19   : > { %1634 = vmatprep.subr.msk.bf16.mxu0 %vm211_vm0, %v1451_v2  ;;  %1585 = vmatpush3.bf16.msra.mxu1 %v340_v4  ;;  %v472_v8 = vsel %vm211_vm0, %v1451_v2, 0  ;;  %v1950_v9 = vld [vmem:[%s2193_s1 + $0xc] sm:$0x3]  ;;  %v1955_v10 = vld [vmem:[%s2193_s1 + $0xe] sm:$0x3]  ;;  %v1968_v12 = vsel %vm211_vm0, %v1462_v5, 0 }
  0x1a   : > { %1635 = vmatprep.subr.msk.bf16.mxu1 %vm211_vm0, %v1462_v5  ;;  %s182_s20 = scalar_lea.vmem %s2192_s0, %s1641_s24  ;;  %vm274_vm2 = vsmask.f32 3328  ;;  %vm275_vm3 = vsmask.f32 7440  ;;  %v1963_v11 = vld [vmem:[%s2193_s1 + $0x10] sm:$0x3] }
  0x1b   : > { %s1965_s28 = scalar_lea.vmem %s182_s20, %s1535_s11  ;;  %v1971_v13 = vsel %vm211_vm0, %v1473_v6, 0  ;;  %v1975_v14 = vsel %vm211_vm0, %v1944_v7, 0  ;;  %v1979_v15 = vsel %vm211_vm0, %v1950_v9, 0  ;;  %v1984_v17 = vsel %vm211_vm0, %v1955_v10, 0  ;;  %vm2004_vm4 = vmor %vm274_vm2, %vm275_vm3  ;;  %s1343_s20 = sadd.s32 %s1531_s8, %s1530_s7 }
  0x1c   : > { %v1715_v16 = vld [vmem:[%s1965_s28] sm:$0xff]   ;;  %v1716_v18 = vld [vmem:[%s1965_s28 + $0x14] sm:$0xff]   ;;  %v1989_v19 = vsel %vm211_vm0, %v1963_v11, 0  ;;  %v268_v20 = vld [vmem:[%s1965_s28 + $0x8] sm:$0xf]  ;;  %s1532_s15 = sshll.u32 %s1343_s20, 6 }
  0x1d   : > { %1580 = vmatprep.mubr.msk.bf16.mxu0 %vm204_vm1, %v1715_v16  ;;  %v269_v21 = vld [vmem:[%s1965_s28 + $0xc] sm:$0xf]  ;;  %v270_v22 = vld [vmem:[%s1965_s28 + $0x10] sm:$0x1]  ;;  %v278_v23 = vshrl.u32 %v268_v20, 16  ;;  %v281_v24 = vshll.u32 %v268_v20, 16  ;;  %s2135_s11 = scalar_lea.hbm %s2195_s3, %s1532_s15 }
  0x1e   : > { %1581 = vmatmul.mubr.msk.bf16.vlgmr.msra.gmra.mxu0 %vm204_vm1, %v1716_v18  ;;  %v287_v25 = vshll.u32 %v269_v21, 16  ;;  %v291_v26 = vshrl.u32 %v269_v21, 16  ;;  %v403_v27 = vld [vmem:[%s1965_s28] sm:$0xf]  ;;  %v297_v28 = vshll.u32 %v270_v22, 16  ;;  %s177_s16 = scalar_lea.vmem [#allocation3], %s1437_s6 }
  0x1f   : > { %1591 = vmatpush3.bf16.msra.mxu0 %v472_v8  ;;  %v404_v29 = vld [vmem:[%s1965_s28 + $0x4] sm:$0xf]  ;;  %v405_v30 = vld [vmem:[%s1965_s28 + $0x8] sm:$0x1]  ;;  %v410_v31 = vshrl.u32 %v403_v27, 16  ;;  %v280_v32 = vrot.slane %v278_v23, 4 }
  0x20   : > { %v283_v33 = vrot.slane %v281_v24, 5  ;;  %v289_v34 = vrot.slane %v287_v25, 5  ;;  %v293_v35 = vrot.slane %v291_v26, 4  ;;  %v271_v36 = vld [vmem:[%s1965_s28 + $0x1c] sm:$0xf]  ;;  %1636 = vmatprep.subr.msk.bf16.mxu0 %vm211_vm0, %v1473_v6  ;;  %v299_v37 = vrot.slane %v297_v28, 5 }
  0x21   : > { %v412_v38 = vrot.slane %v410_v31, 4  ;;  %v413_v39 = vshll.u32 %v403_v27, 16  ;;  %v419_v40 = vshll.u32 %v404_v29, 16  ;;  %v423_v43 = vshrl.u32 %v404_v29, 16  ;;  %v272_v45 = vld [vmem:[%s1965_s28 + $0x20] sm:$0xf] }
  0x22   : > { %v284_v41 = vor.u32 %v283_v33, %v280_v32  ;;  %v294_v42 = vor.u32 %v293_v35, %v289_v34  ;;  %v429_v44 = vshll.u32 %v405_v30, 16  ;;  %v273_v49 = vld [vmem:[%s1965_s28 + $0x24] sm:$0x1]  ;;  %v302_v50 = vshrl.u32 %v271_v36, 16  ;;  %v406_v56 = vld [vmem:[%s1965_s28 + $0x14] sm:$0xf] }
  0x23   : > { %v415_v47 = vrot.slane %v413_v39, 5  ;;  %v421_v48 = vrot.slane %v419_v40, 5  ;;  %v305_v51 = vshll.u32 %v271_v36, 16  ;;  %v425_v54 = vrot.slane %v423_v43, 4  ;;  %v407_v1 = vld [vmem:[%s1965_s28 + $0x18] sm:$0xf] }
  0x24   : > { %v285_v52 = vrot.slane %v284_v41, 4  ;;  %v295_v53 = vrot.slane %v294_v42, 4  ;;  %v431_v55 = vrot.slane %v429_v44, 5  ;;  %v304_v58 = vrot.slane %v302_v50, 4  ;;  %v408_v6 = vld [vmem:[%s1965_s28 + $0x1c] sm:$0x1] }
  0x25   : > { %v416_v57 = vor.u32 %v415_v47, %v412_v38  ;;  %v307_v59 = vrot.slane %v305_v51, 5  ;;  %v311_v60 = vshll.u32 %v272_v45, 16  ;;  %v426_v63 = vor.u32 %v425_v54, %v421_v48  ;;  %v1467_v8 = vld [vmem:[%s1965_s28 + $0xbc] sm:$0xf]  ;;  %v1468_v30 = vld [vmem:[%s1965_s28 + $0xc0] sm:$0xf] }
  0x26   : > { %v290_v61 = vsel %vm2004_vm4, %v285_v52, %v289_v34  ;;  %v300_v62 = vsel %vm2004_vm4, %v295_v53, %v299_v37  ;;  %v315_v0 = vshrl.u32 %v272_v45, 16  ;;  %v321_v20 = vshll.u32 %v273_v49, 16  ;;  %v1469_v35 = vld [vmem:[%s1965_s28 + $0xc4] sm:$0x1]  ;;  %v1470_v40 = vld [vmem:[%s1965_s28 + $0xd0] sm:$0xf] }
  0x27   : > { %v1447_v2 = vcombine.low %v290_v61, %v300_v62  ;;  %v417_v3 = vrot.slane %v416_v57, 4  ;;  %v308_v4 = vor.u32 %v307_v59, %v304_v58  ;;  %v313_v5 = vrot.slane %v311_v60, 5  ;;  %v1471_v45 = vld [vmem:[%s1965_s28 + $0xd4] sm:$0xf]  ;;  %v1472_v62 = vld [vmem:[%s1965_s28 + $0xd8] sm:$0x1] }
  0x28   : > { %v427_v16 = vrot.slane %v426_v63, 4  ;;  %v317_v18 = vrot.slane %v315_v0, 4  ;;  %v434_v21 = vshrl.u32 %v406_v56, 16  ;;  %v437_v24 = vshll.u32 %v406_v56, 16  ;;  %v1717_v50 = vld [vmem:[%s1965_s28 + $0xb4] sm:$0xff]   ;;  %s1346_s21 = sshll.u32 %s177_s16, 4  ;;  %s2137_s21 = int_to_ptr.vmem [resolvable:$true] %s1346_s21 }
  0x29   : > { %1586 = vmatprep.mubr.msk.bf16.mxu1 %vm204_vm1, %v1447_v2  ;;  %v422_v22 = vsel %vm2004_vm4, %v417_v3, %v421_v48  ;;  %v309_v23 = vrot.slane %v308_v4, 4  ;;  %v443_v25 = vshll.u32 %v407_v1, 16  ;;  %v323_v28 = vrot.slane %v321_v20, 5  ;;  %s2141_s24 = scalar_lea.sflag [#allocation4], %s175_s29  ;;  %s1729_s4 = scalar_lea.vmem %s2137_s21, 256 }
  0x2a   : > { %v432_v26 = vsel %vm2004_vm4, %v427_v16, %v431_v55  ;;  %v318_v27 = vor.u32 %v317_v18, %v313_v5  ;;  %v436_v29 = vrot.slane %v434_v21, 4  ;;  %v439_v33 = vrot.slane %v437_v24, 5  ;;  %p1730_p13 = scmp.ne.s32.totalorder %s2137_s21, %s1729_s4  ;;  %s1733_s6 = sshll.u32 %s1823_s5, 4  ;;  %s1734_s6 = int_to_ptr.vmem [resolvable:$false] %s1733_s6 }
  0x2b   : > { %v1452_v31 = vcombine.low %v422_v22, %v432_v26  ;;  %v314_v32 = vsel %vm2004_vm4, %v309_v23, %v313_v5  ;;  %v445_v34 = vrot.slane %v443_v25, 5  ;;  %v447_v37 = vshrl.u32 %v407_v1, 16  ;;  %v1478_v1 = vld [vmem:[%s1965_s28 + $0xb4] sm:$0xf]  ;;  %v1479_v22 = vld [vmem:[%s1965_s28 + $0xb8] sm:$0xf]  ;;  %p1736_p2 = scmp.lt.s32.totalorder %s2137_s21, %s1734_s6 }
  0x2c   : > { %v319_v36 = vrot.slane %v318_v27, 4  ;;  %v453_v38 = vshll.u32 %v408_v6, 16  ;;  %v632_v39 = vshrl.u32 %v1467_v8, 16  ;;  %v440_v41 = vor.u32 %v439_v33, %v436_v29  ;;  %v1718_v26 = vld [vmem:[%s1965_s28 + $0xc8] sm:$0xff]   ;;  %v1480_v29 = vld [vmem:[%s1965_s28 + $0xbc] sm:$0x1]  ;;  %p1731_p0 = pnand %p1730_p13, %p1897_p3 }
  0x2d   : > { %1592 = vmatprep.mubr.msk.bf16.mxu0 %vm204_vm1, %v1452_v31  ;;  %v635_v42 = vshll.u32 %v1467_v8, 16  ;;  %v641_v43 = vshll.u32 %v1468_v30, 16  ;;  %v645_v44 = vshrl.u32 %v1468_v30, 16  ;;  %v449_v48 = vrot.slane %v447_v37, 4  ;;  %s1735_s7 = scalar_lea.vmem %s1734_s6, 512 }
  0x2e   : > { %v324_v47 = vsel %vm2004_vm4, %v319_v36, %v323_v28  ;;  %v455_v49 = vrot.slane %v453_v38, 5  ;;  %v634_v51 = vrot.slane %v632_v39, 4  ;;  %v441_v53 = vrot.slane %v440_v41, 4  ;;  %v1482_v41 = vld [vmem:[%s1965_s28 + $0xcc] sm:$0xf]  ;;  %p1732_p1 = pneg %p1731_p0  ;;  %p1737_p4 = scmp.lt.s32.totalorder %s1735_s7, %s1729_s4 }
  0x2f   : > { %v1448_v52 = vcombine.low %v314_v32, %v324_v47  ;;  %v637_v54 = vrot.slane %v635_v42, 5  ;;  %v643_v55 = vrot.slane %v641_v43, 5  ;;  %v450_v56 = vor.u32 %v449_v48, %v445_v34  ;;  %v1483_v47 = vld [vmem:[%s1965_s28 + $0xd0] sm:$0x1] }
  0x30   : > { %v647_v57 = vrot.slane %v645_v44, 4  ;;  %v651_v58 = vshll.u32 %v1469_v35, 16  ;;  %v656_v59 = vshrl.u32 %v1470_v40, 16  ;;  %v446_v60 = vsel %vm2004_vm4, %v441_v53, %v445_v34  ;;  %p1738_p5 = por %p1737_p4, %p1736_p2 }
  0x31   : > { %1587 = vmatmul.mubr.msk.bf16.vlgmr.msra.gmra.mxu1 %vm204_vm1, %v1448_v52  ;;  %v638_v61 = vor.u32 %v637_v54, %v634_v51  ;;  %v659_v63 = vshll.u32 %v1470_v40, 16  ;;  %v665_v0 = vshll.u32 %v1471_v45, 16  ;;  %v451_v2 = vrot.slane %v450_v56, 4  ;;  %v1500_v52 = vld [vmem:[%s1965_s28 + $0x1c] sm:$0xf] }
  0x32   : > { %1597 = vmatpush3.bf16.msra.mxu1 %v1968_v12  ;;  %1598 = vmatprep.mubr.msk.bf16.mxu1 %vm204_vm1, %v1717_v50  ;;  %v648_v3 = vor.u32 %v647_v57, %v643_v55  ;;  %v653_v4 = vrot.slane %v651_v58, 5  ;;  %v658_v5 = vrot.slane %v656_v59, 4  ;;  %v669_v18 = vshrl.u32 %v1471_v45, 16  ;;  %p1739_p6 = pnand %p1738_p5, %p1732_p1 }
  0x33   : > { %v639_v6 = vrot.slane %v638_v61, 4  ;;  %1637 = vmatprep.subr.msk.bf16.mxu1 %vm211_vm0, %v1944_v7  ;;  %v661_v8 = vrot.slane %v659_v63, 5  ;;  %v667_v16 = vrot.slane %v665_v0, 5  ;;  %v456_v20 = vsel %vm2004_vm4, %v451_v2, %v455_v49  ;;  %v1481_v7 = vld [vmem:[%s1965_s28 + $0xc8] sm:$0xf] }
  0x34   : > { %v649_v21 = vrot.slane %v648_v3, 4  ;;  %v675_v12 = vshll.u32 %v1472_v62, 16  ;;  %v764_v23 = vshrl.u32 %v1478_v1, 16  ;;  %v1453_v24 = vcombine.low %v446_v60, %v456_v20  ;;  %v1501_v60 = vld [vmem:[%s1965_s28 + $0x20] sm:$0xf] }
  0x35   : > { %v644_v25 = vsel %vm2004_vm4, %v639_v6, %v643_v55  ;;  %v662_v27 = vor.u32 %v661_v8, %v658_v5  ;;  %v671_v28 = vrot.slane %v669_v18, 4  ;;  %v767_v33 = vshll.u32 %v1478_v1, 16  ;;  %v1502_v0 = vld [vmem:[%s1965_s28 + $0x24] sm:$0x1]  ;;  %v1511_v18 = vld [vmem:[%s1965_s28 + $0x14] sm:$0xf] }
  0x36   : > { %v654_v30 = vsel %vm2004_vm4, %v649_v21, %v653_v4  ;;  %v677_v31 = vrot.slane %v675_v12, 5  ;;  %v766_v32 = vrot.slane %v764_v23, 4  ;;  %1593 = vmatmul.mubr.msk.bf16.vlgmr.msra.gmra.mxu0 %vm204_vm1, %v1453_v24  ;;  %v773_v37 = vshll.u32 %v1479_v22, 16  ;;  %v1512_v23 = vld [vmem:[%s1965_s28 + $0x18] sm:$0xf] }
  0x37   : > { %v1474_v34 = vcombine.low %v644_v25, %v654_v30  ;;  %v663_v35 = vrot.slane %v662_v27, 4  ;;  %v672_v36 = vor.u32 %v671_v28, %v667_v16  ;;  %1603 = vmatpush3.bf16.msra.mxu0 %v1971_v13  ;;  %v769_v38 = vrot.slane %v767_v33, 5 }
  0x38   : > { %v777_v39 = vshrl.u32 %v1479_v22, 16  ;;  %v783_v40 = vshll.u32 %v1480_v29, 16  ;;  %v788_v42 = vshrl.u32 %v1481_v7, 16  ;;  %v775_v45 = vrot.slane %v773_v37, 5  ;;  %1638 = vmatprep.subr.msk.bf16.mxu0 %vm211_vm0, %v1950_v9  ;;  %v1719_v9 = vld [vmem:[%s1965_s28 + $0x14] sm:$0xff]  }
  0x39   : > { %1604 = vmatprep.mubr.msk.bf16.mxu0 %vm204_vm1, %v1474_v34  ;;  %1599 = vmatmul.mubr.msk.bf16.vlgmr.msra.gmra.mxu1 %vm204_vm1, %v1718_v26  ;;  %v668_v43 = vsel %vm2004_vm4, %v663_v35, %v667_v16  ;;  %v673_v44 = vrot.slane %v672_v36, 4  ;;  %v791_v48 = vshll.u32 %v1481_v7, 16  ;;  %v770_v13 = vor.u32 %v769_v38, %v766_v32  ;;  %v1513_v7 = vld [vmem:[%s1965_s28 + $0x1c] sm:$0x1]  ;;  %v1720_v32 = vld [vmem:[%s1965_s28 + $0x28] sm:$0xff]  }
  0x3a   : > { %1609 = vmatpush3.bf16.msra.mxu1 %v1975_v14  ;;  %v779_v49 = vrot.slane %v777_v39, 4  ;;  %v785_v50 = vrot.slane %v783_v40, 5  ;;  %v790_v51 = vrot.slane %v788_v42, 4  ;;  %v797_v55 = vshll.u32 %v1482_v41, 16  ;;  %v1503_v36 = vld [vmem:[%s1965_s28 + $0x30] sm:$0xf] }
  0x3b   : > { %v678_v53 = vsel %vm2004_vm4, %v673_v44, %v677_v31  ;;  %1639 = vmatprep.subr.msk.bf16.mxu1 %vm211_vm0, %v1955_v10  ;;  %v793_v54 = vrot.slane %v791_v48, 5  ;;  %v801_v56 = vshrl.u32 %v1482_v41, 16  ;;  %v771_v57 = vrot.slane %v770_v13, 4  ;;  %v1504_v40 = vld [vmem:[%s1965_s28 + $0x34] sm:$0xf] }
  0x3c   : > { %v1475_v14 = vcombine.low %v668_v43, %v678_v53  ;;  %v780_v58 = vor.u32 %v779_v49, %v775_v45  ;;  %v807_v59 = vshll.u32 %v1483_v47, 16  ;;  %v799_v62 = vrot.slane %v797_v55, 5 }
  0x3d   : > { %v794_v61 = vor.u32 %v793_v54, %v790_v51  ;;  %v803_v63 = vrot.slane %v801_v56, 4  ;;  %v986_v1 = vshrl.u32 %v1500_v52, 16  ;;  %v776_v2 = vsel %vm2004_vm4, %v771_v57, %v775_v45  ;;  %v1514_v54 = vld [vmem:[%s1965_s28 + $0x28] sm:$0xf] }
  0x3e   : > { %v781_v10 = vrot.slane %v780_v58, 4  ;;  %v809_v3 = vrot.slane %v807_v59, 5  ;;  %v989_v4 = vshll.u32 %v1500_v52, 16  ;;  %1605 = vmatmul.mubr.msk.bf16.vlgmr.msra.gmra.mxu0 %vm204_vm1, %v1475_v14  ;;  %v995_v16 = vshll.u32 %v1501_v60, 16  ;;  %v1505_v52 = vld [vmem:[%s1965_s28 + $0x38] sm:$0x1] }
  0x3f   : > { %v795_v5 = vrot.slane %v794_v61, 4  ;;  %v804_v6 = vor.u32 %v803_v63, %v799_v62  ;;  %v988_v8 = vrot.slane %v986_v1, 4  ;;  %1615 = vmatpush3.bf16.msra.mxu0 %v1979_v15  ;;  %1616 = vmatprep.mubr.msk.bf16.mxu0 %vm204_vm1, %v1719_v9  ;;  %v999_v12 = vshrl.u32 %v1501_v60, 16  ;;  %v1515_v58 = vld [vmem:[%s1965_s28 + $0x2c] sm:$0xf] }
  0x40   : > { %v786_v20 = vsel %vm2004_vm4, %v781_v10, %v785_v50  ;;  %v991_v21 = vrot.slane %v989_v4, 5  ;;  %v1005_v22 = vshll.u32 %v1502_v0, 16  ;;  %1640 = vmatprep.subr.msk.bf16.mxu0 %vm211_vm0, %v1963_v11  ;;  %v997_v15 = vrot.slane %v995_v16, 5 }
  0x41   : > { %v1485_v24 = vcombine.low %v776_v2, %v786_v20  ;;  %v800_v25 = vsel %vm2004_vm4, %v795_v5, %v799_v62  ;;  %v805_v26 = vrot.slane %v804_v6, 4  ;;  %v1001_v28 = vrot.slane %v999_v12, 4  ;;  %v1516_v2 = vld [vmem:[%s1965_s28 + $0x30] sm:$0x1] }
  0x42   : > { %v992_v27 = vor.u32 %v991_v21, %v988_v8  ;;  %v1007_v29 = vrot.slane %v1005_v22, 5  ;;  %v1118_v30 = vshrl.u32 %v1511_v18, 16  ;;  %v1121_v33 = vshll.u32 %v1511_v18, 16 }
  0x43   : > { %1610 = vmatprep.mubr.msk.bf16.mxu1 %vm204_vm1, %v1485_v24  ;;  %v810_v31 = vsel %vm2004_vm4, %v805_v26, %v809_v3  ;;  %v1127_v34 = vshll.u32 %v1512_v23, 16  ;;  %v1131_v35 = vshrl.u32 %v1512_v23, 16  ;;  %v1002_v11 = vor.u32 %v1001_v28, %v997_v15 }
  0x44   : > { %v1486_v37 = vcombine.low %v800_v25, %v810_v31  ;;  %v993_v38 = vrot.slane %v992_v27, 4  ;;  %v1120_v39 = vrot.slane %v1118_v30, 4  ;;  %v1123_v41 = vrot.slane %v1121_v33, 5 }
  0x45   : > { %v1129_v42 = vrot.slane %v1127_v34, 5  ;;  %v1133_v43 = vrot.slane %v1131_v35, 4  ;;  %v1137_v44 = vshll.u32 %v1513_v7, 16  ;;  %v1003_v47 = vrot.slane %v1002_v11, 4 }
  0x46   : > { %1611 = vmatmul.mubr.msk.bf16.vlgmr.msra.gmra.mxu1 %vm204_vm1, %v1486_v37  ;;  %v998_v45 = vsel %vm2004_vm4, %v993_v38, %v997_v15  ;;  %v1010_v48 = vshrl.u32 %v1503_v36, 16  ;;  %v1013_v13 = vshll.u32 %v1503_v36, 16  ;;  %1617 = vmatmul.mubr.msk.bf16.vlgmr.msra.gmra.mxu0 %vm204_vm1, %v1720_v32  ;;  %v1124_v49 = vor.u32 %v1123_v41, %v1120_v39 }
  0x47   : > { %1621 = vmatpush3.bf16.msra.mxu1 %v1984_v17  ;;  %v1134_v50 = vor.u32 %v1133_v43, %v1129_v42  ;;  %v1139_v51 = vrot.slane %v1137_v44, 5  ;;  %v1019_v53 = vshll.u32 %v1504_v40, 16  ;;  %1627 = vmatpush3.bf16.msra.mxu0 %v1989_v19  ;;  %v1008_v55 = vsel %vm2004_vm4, %v1003_v47, %v1007_v29 }
  0x48   : > { %v1012_v56 = vrot.slane %v1010_v48, 4  ;;  %v1015_v14 = vrot.slane %v1013_v13, 5  ;;  %v1023_v57 = vshrl.u32 %v1504_v40, 16  ;;  %v1507_v9 = vcombine.low %v998_v45, %v1008_v55 }
  0x49   : > { %v1125_v59 = vrot.slane %v1124_v49, 4  ;;  %v1135_v60 = vrot.slane %v1134_v50, 4  ;;  %v1021_v17 = vrot.slane %v1019_v53, 5  ;;  %v1029_v63 = vshll.u32 %v1505_v52, 16 }
  0x4a   : > { %v1016_v61 = vor.u32 %v1015_v14, %v1012_v56  ;;  %v1025_v62 = vrot.slane %v1023_v57, 4  ;;  %v1142_v0 = vshrl.u32 %v1514_v54, 16  ;;  %1622 = vmatprep.mubr.msk.bf16.mxu1 %vm204_vm1, %v1507_v9  ;;  %v1145_v10 = vshll.u32 %v1514_v54, 16 }
  0x4b   : > { %v1130_v19 = vsel %vm2004_vm4, %v1125_v59, %v1129_v42  ;;  %v1140_v1 = vsel %vm2004_vm4, %v1135_v60, %v1139_v51  ;;  %v1151_v3 = vshll.u32 %v1515_v58, 16  ;;  %v1031_v8 = vrot.slane %v1029_v63, 5 }
  0x4c   : > { %v1518_v4 = vcombine.low %v1130_v19, %v1140_v1  ;;  %v1017_v5 = vrot.slane %v1016_v61, 4  ;;  %v1026_v6 = vor.u32 %v1025_v62, %v1021_v17  ;;  %v1144_v16 = vrot.slane %v1142_v0, 4 }
  0x4d   : > { %v1147_v18 = vrot.slane %v1145_v10, 5  ;;  %v1153_v20 = vrot.slane %v1151_v3, 5  ;;  %v1155_v21 = vshrl.u32 %v1515_v58, 16  ;;  %v1161_v23 = vshll.u32 %v1516_v2, 16 }
  0x4e   : > { %1628 = vmatprep.mubr.msk.bf16.mxu0 %vm204_vm1, %v1518_v4  ;;  %v1022_v12 = vsel %vm2004_vm4, %v1017_v5, %v1021_v17  ;;  %v1027_v22 = vrot.slane %v1026_v6, 4 }
  0x4f   : > { %v1148_v24 = vor.u32 %v1147_v18, %v1144_v16  ;;  %v1157_v25 = vrot.slane %v1155_v21, 4  ;;  %v1163_v29 = vrot.slane %v1161_v23, 5 }
  0x50   : > { %v1032_v26 = vsel %vm2004_vm4, %v1027_v22, %v1031_v8 }
  0x51   : > { %v1508_v15 = vcombine.low %v1022_v12, %v1032_v26  ;;  %v1149_v27 = vrot.slane %v1148_v24, 4  ;;  %v1158_v28 = vor.u32 %v1157_v25, %v1153_v20 }
  0x53   : > { %1623 = vmatmul.mubr.msk.bf16.vlgmr.msra.gmra.mxu1 %vm204_vm1, %v1508_v15  ;;  %v1154_v7 = vsel %vm2004_vm4, %v1149_v27, %v1153_v20  ;;  %v1159_v30 = vrot.slane %v1158_v28, 4  ;;  %v1522_v27 = vld [vmem:[%s2194_s2] ss:$0 sm:$0xff] }
  0x55   : > { %v1164_v31 = vsel %vm2004_vm4, %v1159_v30, %v1163_v29 }
  0x56   : > { %v1519_v32 = vcombine.low %v1154_v7, %v1164_v31 }
  0x58   : > { %1629 = vmatmul.mubr.msk.bf16.vlgmr.msra.gmra.mxu0 %vm204_vm1, %v1519_v32 }
  0xde   : > { %v1582_v33 = vpop.f32.mrf.mxu0 }
  0xe0   : > { %v249_v34 = vpop.f32.mrf.mxu0 }
  0xe2   : > { %v1583_v35 = vpop.f32.mrf.mxu0 }
  0xe4   : > { %v252_v38 = vpop.f32.mrf.mxu0 }
  0xf1   : > { %v1588_v36 = vpop.f32.mrf.mxu1 }
  0xf2   : > { %v397_v49 = vadd.f32 %v1588_v36, %v1582_v33 }
  0xf3   : > { %v376_v37 = vpop.f32.mrf.mxu1 }
  0xf4   : > { %v395_v51 = vadd.f32 %v376_v37, %v249_v34 }
  0xf5   : > { %v1589_v11 = vpop.f32.mrf.mxu1 }
  0xf6   : > { %v1594_v39 = vpop.f32.mrf.mxu0  ;;  %v398_v55 = vadd.f32 %v1589_v11, %v1583_v35 }
  0xf7   : > { %v379_v40 = vpop.f32.mrf.mxu1  ;;  %v529_v54 = vadd.f32 %v1594_v39, %v397_v49 }
  0xf8   : > { %v508_v41 = vpop.f32.mrf.mxu0  ;;  %v396_v9 = vadd.f32 %v379_v40, %v252_v38 }
  0xf9   : > { %v1600_v42 = vpop.f32.mrf.mxu1  ;;  %v527_v57 = vadd.f32 %v508_v41, %v395_v51 }
  0xfa   : > { %v1595_v43 = vpop.f32.mrf.mxu0  ;;  %v619_v58 = vadd.f32 %v1600_v42, %v529_v54 }
  0xfb   : > { %v598_v44 = vpop.f32.mrf.mxu1  ;;  %v530_v59 = vadd.f32 %v1595_v43, %v398_v55 }
  0xfc   : > { %v511_v45 = vpop.f32.mrf.mxu0  ;;  %v617_v60 = vadd.f32 %v598_v44, %v527_v57 }
  0xfd   : > { %v1601_v47 = vpop.f32.mrf.mxu1  ;;  %v528_v0 = vadd.f32 %v511_v45, %v396_v9 }
  0xfe   : > { %v1606_v46 = vpop.f32.mrf.mxu0  ;;  %v620_v63 = vadd.f32 %v1601_v47, %v530_v59 }
  0xff   : > { %v601_v13 = vpop.f32.mrf.mxu1  ;;  %v751_v62 = vadd.f32 %v1606_v46, %v619_v58 }
 0x100   : > { %v730_v48 = vpop.f32.mrf.mxu0  ;;  %v618_v10 = vadd.f32 %v601_v13, %v528_v0 }
 0x101   : > { %v749_v19 = vadd.f32 %v730_v48, %v617_v60 }
 0x102   : > { %v1607_v50 = vpop.f32.mrf.mxu0 }
 0x103   : > { %v752_v4 = vadd.f32 %v1607_v50, %v620_v63 }
 0x104   : > { %v733_v52 = vpop.f32.mrf.mxu0 }
 0x105   : > { %v750_v18 = vadd.f32 %v733_v52, %v618_v10 }
 0x106   : > { %v1612_v53 = vpop.f32.mrf.mxu1  ;;  %v1618_v56 = vpop.f32.mrf.mxu0 }
 0x107   : > { %v883_v1 = vadd.f32 %v1612_v53, %v751_v62 }
 0x108   : > { %v862_v14 = vpop.f32.mrf.mxu1  ;;  %v952_v61 = vpop.f32.mrf.mxu0 }
 0x109   : > { %v881_v5 = vadd.f32 %v862_v14, %v749_v19  ;;  %v973_v6 = vadd.f32 %v1618_v56, %v883_v1  ;;  %v1523_v19 = vld [vmem:[%s2194_s2 + $0x1] ss:$0 sm:$0xff] }
 0x10a   : > { %v1613_v17 = vpop.f32.mrf.mxu1  ;;  %v1619_v3 = vpop.f32.mrf.mxu0 }
 0x10b   : > { %v884_v8 = vadd.f32 %v1613_v17, %v752_v4  ;;  %v971_v21 = vadd.f32 %v952_v61, %v881_v5 }
 0x10c   : > { %v865_v2 = vpop.f32.mrf.mxu1  ;;  %v955_v20 = vpop.f32.mrf.mxu0 }
 0x10d   : > { %v882_v23 = vadd.f32 %v865_v2, %v750_v18  ;;  %v974_v24 = vadd.f32 %v1619_v3, %v884_v8 }
 0x10f   : > { %v972_v30 = vadd.f32 %v955_v20, %v882_v23 }
 0x113   : > { %v1624_v16 = vpop.f32.mrf.mxu1 }
 0x114   : > { %v1105_v12 = vadd.f32 %v1624_v16, %v973_v6  ;;  %v1524_v16 = vld [vmem:[%s2194_s2 + $0x2] ss:$0 sm:$0xff] }
 0x115   : > { %v1084_v22 = vpop.f32.mrf.mxu1 }
 0x116   : > { %v1103_v25 = vadd.f32 %v1084_v22, %v971_v21 }
 0x117   : > { %v1625_v26 = vpop.f32.mrf.mxu1 }
 0x118   : > { %v1630_v15 = vpop.f32.mrf.mxu0  ;;  %v1106_v29 = vadd.f32 %v1625_v26, %v974_v24 }
 0x119   : > { %v1237_v28 = vadd.f32 %v1630_v15, %v1105_v12  ;;  %v1087_v7 = vpop.f32.mrf.mxu1 }
 0x11a   : > { %v1216_v31 = vpop.f32.mrf.mxu0  ;;  %v1104_v35 = vadd.f32 %v1087_v7, %v972_v30 }
 0x11b   : > { %v1254_v32 = vadd.f32 %v1522_v27, %v1237_v28  ;;  %v1235_v33 = vadd.f32 %v1216_v31, %v1103_v25 }
 0x11c   : > { %v1631_v34 = vpop.f32.mrf.mxu0 }
 0x11d   : > { %v1262_v36 = vmul.f32 0.044715, %v1254_v32  ;;  %v1252_v37 = vadd.f32 %v1522_v27, %v1235_v33  ;;  %v1238_v38 = vadd.f32 %v1631_v34, %v1106_v29  ;;  %v1258_v59 = vmul.f32 0.5, %v1254_v32 }
 0x11e   : > { %v1219_v41 = vpop.f32.mrf.mxu0 }
 0x11f   : > { %v1266_v11 = vmul.f32 %v1262_v36, %v1254_v32  ;;  %v1260_v39 = vmul.f32 0.044715, %v1252_v37  ;;  %v1255_v40 = vadd.f32 %v1522_v27, %v1238_v38  ;;  %v1236_v42 = vadd.f32 %v1219_v41, %v1104_v35 }
 0x120   : > { %v1256_v0 = vmul.f32 0.5, %v1252_v37 }
 0x121   : > { %v1270_v43 = vmul.f32 %v1266_v11, %v1254_v32  ;;  %v1264_v44 = vmul.f32 %v1260_v39, %v1252_v37  ;;  %v1263_v45 = vmul.f32 0.044715, %v1255_v40  ;;  %v1253_v47 = vadd.f32 %v1522_v27, %v1236_v42 }
 0x122   : > { %v1259_v1 = vmul.f32 0.5, %v1255_v40 }
 0x123   : > { %v1274_v46 = vadd.f32 %v1270_v43, %v1254_v32  ;;  %v1268_v48 = vmul.f32 %v1264_v44, %v1252_v37  ;;  %v1267_v13 = vmul.f32 %v1263_v45, %v1255_v40  ;;  %v1261_v49 = vmul.f32 0.044715, %v1253_v47 }
 0x124   : > { %v1257_v6 = vmul.f32 0.5, %v1253_v47 }
 0x125   : > { %v1278_v50 = vmul.f32 0.7978846, %v1274_v46  ;;  %v1272_v51 = vadd.f32 %v1268_v48, %v1252_v37  ;;  %v1271_v52 = vmul.f32 %v1267_v13, %v1255_v40  ;;  %v1265_v53 = vmul.f32 %v1261_v49, %v1253_v47 }
 0x127   : > { %1721 = vtanh.f32 %v1278_v50  ;;  %v1276_v54 = vmul.f32 0.7978846, %v1272_v51  ;;  %v1275_v55 = vadd.f32 %v1271_v52, %v1255_v40  ;;  %v1269_v56 = vmul.f32 %v1265_v53, %v1253_v47 }
 0x129   : > { %1723 = vtanh.f32 %v1276_v54  ;;  %v1279_v14 = vmul.f32 0.7978846, %v1275_v55  ;;  %v1273_v57 = vadd.f32 %v1269_v56, %v1253_v47 }
 0x12b   : > { %1725 = vtanh.f32 %v1279_v14  ;;  %v1277_v58 = vmul.f32 0.7978846, %v1273_v57 }
 0x12d   : > { %1727 = vtanh.f32 %v1277_v58 }
 0x134   : > { %v1722_v9 = vpop.eup %1721 }
 0x135   : > { %v1286_v60 = vadd.f32 1.0, %v1722_v9 }
 0x136   : > { %v1724_v17 = vpop.eup %1723 }
 0x137   : > { %v1290_v61 = vmul.f32 %v1286_v60, %v1258_v59  ;;  %v1284_v62 = vadd.f32 1.0, %v1724_v17 }
 0x138   : > { %v1726_v63 = vpop.eup %1725 }
 0x139   : > { %v1287_v2 = vadd.f32 1.0, %v1726_v63  ;;  %v1288_v10 = vmul.f32 %v1284_v62, %v1256_v0  ;;  %v1299_v5 = vmul.f32 %v1523_v19, %v1290_v61 }
 0x13a   : > { %v1728_v3 = vpop.eup %1727 }
 0x13b   : > { %v1291_v4 = vmul.f32 %v1287_v2, %v1259_v1  ;;  %v1285_v8 = vadd.f32 1.0, %v1728_v3  ;;  %v1297_v21 = vmul.f32 %v1523_v19, %v1288_v10  ;;  %v1308_v12 = vadd.f32 %v1524_v16, %v1299_v5 }
 0x13d   : > { %v1300_v18 = vmul.f32 %v1523_v19, %v1291_v4  ;;  %v1289_v20 = vmul.f32 %v1285_v8, %v1257_v6  ;;  %v1306_v25 = vadd.f32 %v1524_v16, %v1297_v21 }
 0x13f   : > { %v1309_v22 = vadd.f32 %v1524_v16, %v1300_v18  ;;  %v1298_v23 = vmul.f32 %v1523_v19, %v1289_v20 }
 0x141   : > { %v1548_v24 = vpack.c.bf16 %v1309_v22, %v1308_v12  ;;  %v1307_v26 = vadd.f32 %v1524_v16, %v1298_v23 }
 0x143   : > { %1550 = vst [vmem:[%s177_s16 + $0x8] sm:$0xff] %v1548_v24   ;;  %v1543_v15 = vpack.c.bf16 %v1307_v26, %v1306_v25 }
 0x145   : > { %1544 = vst [vmem:[%s177_s16] sm:$0xff] %v1543_v15  }
 0x146   : > { %1742 = shalt.err (!%p1739_p6)
}
 0x147   : > { %s1743_s29 = scalar_lea.hbm %s2135_s11, 256  ;;  %s1747_s10 = scalar_lea.hbm %s2195_s3, 2048 }
 0x148   : > { %p1744_p7 = scmp.ne.s32.totalorder %s2135_s11, %s1743_s29  ;;  %p1748_p11 = scmp.lt.s32.totalorder %s2135_s11, %s2195_s3 }
 0x149   : > { %p1749_p12 = scmp.lt.s32.totalorder %s1747_s10, %s1743_s29 }
 0x14a   : > { %p1745_p9 = pnand %p1744_p7, %p1897_p3 }
 0x14b   : > { %p1750_p13 = por %p1749_p12, %p1748_p11 }
 0x14c   : > { %p1746_p10 = pneg %p1745_p9 }
 0x14e   : > { %p1751_p0 = pnand %p1750_p13, %p1746_p10 }
 0x150   : > { %1754 = shalt.err (!%p1751_p0)
}
 0x151   : > { %s1824_s16 = smov 64   ;;  %s1825_s27 = smov 4  }
 0x152   : > { %1642 = dma.vmem_to_hbm [thread:$0]  (%p1897_p3), %s2137_s21, 256, %s2135_s11, %s2141_s24, %s1824_s16, %s1824_s16, %s1825_s27  }
 0x153 PF: > { %p1648_p1 = scmp.ge.s32.totalorder %s1821_s19, 2  ;;  %s1361_s28 = sand.u32 1, %s1793_s12  }
 0x154   : > { %s1362_s4 = scalar_lea.sflag [#allocation4], %s1361_s28 }
 0x155   : > { %p1645_p2 = pnand %p1648_p1, %p1906_p8 }
 0x157   : > { %p1646_p4 = pneg %p1645_p2 }
 0x159   : > { %1788 = dma.done.wait (%p1646_p4), %s1362_s4, 256  }
 0x15a   : > { %1790 = vsyncadd (%p1646_p4), %s1362_s4, 4294967040  ;;  %s16_s19 = sadd.s32 1, %s1821_s19   ;;  %s2200_s12 = smov %s1797_s13 }
 0x15b   : > { %p13_p5 = scmp.ge.s32.totalorder %s16_s19, 10   ;;  %s2201_s13 = smov %s1801_s14 }
 0x15c   : > { %s2202_s14 = smov %s1915_s30  ;;  %s2203_s15 = smov %s1813_s17 }
 0x15d   : > { %s2204_s16 = smov %s1817_s18  ;;  %s2205_s17 = smov %s2208_s22 }
 0x15e   : > { %s2206_s18 = smov %s2212_s23  ;;  %15 = sbr.rel (!%p13_p5) target bundleno = 5 (0x5), region = 78 }
 0x163   :  { %1367 = vsyncpa [#allocation4], 1 }
 0x164   :  { %1369 = vsyncpa [#allocation4 + $0x1], 1 }

</bundles_post_ra>
